<compile_context>
chip_gen: v6e
topology: v6e:2x2x1
jax: 0.10.0
libtpu: 0.0.40
codegen_flags: <defaults>
</compile_context>

<pallas_src>
import jax
import jax.numpy as jnp
from jax.experimental import pallas as pl
from jax.experimental.pallas import tpu as pltpu

# ----- problem sizes (QMixer args) -----
N_AGENTS = 4
STATE_DIM = 32
EMBED_DIM = 32

_NE = N_AGENTS * EMBED_DIM                    # 128: hyper_w_1 output width
_FUSED = _NE + 3 * EMBED_DIM                  # 224 useful fused columns
_FUSED_PAD = ((_FUSED + 127) // 128) * 128    # 256: lane-padded fused width


def _round_up(x, m):
    return ((x + m - 1) // m) * m


def qmix_kernel(aq_ref, st_ref, wcat_ref, bcat_ref, e_ref, g_ref,
                wv2_ref, bv2_ref, out_ref):
    st = st_ref[...].astype(jnp.float32)       # (bm, state_dim)
    aq = aq_ref[...].astype(jnp.float32)       # (bm, n_agents)

    # One fused hypernet matmul: columns are [w1 | b1 | w_final | V-hidden | pad].
    z = jnp.dot(st, wcat_ref[...], preferred_element_type=jnp.float32) + bcat_ref[...]
    w1 = jnp.abs(z[:, :_NE])                                   # (bm, n_agents*embed)
    b1 = z[:, _NE:_NE + EMBED_DIM]                             # (bm, embed)
    wf = jnp.abs(z[:, _NE + EMBED_DIM:_NE + 2 * EMBED_DIM])    # (bm, embed)
    h1 = jnp.maximum(z[:, _NE + 2 * EMBED_DIM:_NE + 3 * EMBED_DIM], 0.0)  # V ReLU

    # bmm(agent_qs[B,1,n], w1[B,n,e]) on the MXU:
    #   aq_rep = aq @ E   replicates each agent's q across its 32-lane group,
    #   mixed  = (aq_rep * w1) @ G   sums the agent groups down to embed lanes.
    aq_rep = jnp.dot(aq, e_ref[...], preferred_element_type=jnp.float32)   # (bm, 128)
    mixed = jnp.dot(aq_rep * w1, g_ref[...], preferred_element_type=jnp.float32)
    hidden = mixed + b1
    # ELU(alpha=1); clamp the exp argument so the unselected branch stays finite.
    hidden = jnp.where(hidden > 0.0, hidden,
                       jnp.exp(jnp.minimum(hidden, 0.0)) - 1.0)

    # Final embed contraction (per-row reduce of hidden*w_final) + V output layer.
    q = (jnp.sum(hidden * wf, axis=-1, keepdims=True)
         + jnp.dot(h1, wv2_ref[...], preferred_element_type=jnp.float32)
         + bv2_ref[...])
    out_ref[...] = q.astype(out_ref.dtype)


def qmix_forward(agent_qs, states, params, *, block_rows=1024):
    """agent_qs: (bs, T, n_agents), states: (bs, T, state_dim) -> (bs, T, 1)."""
    (w1, b1, wb, bb, wf, bf, wv1, bv1, wv2, bv2) = params
    bs, T, n = agent_qs.shape
    assert n == N_AGENTS
    B = bs * T
    out_dtype = agent_qs.dtype

    # Keep inputs in their native dtype (no wrapper-side astype round trip);
    # the kernel casts/accumulates in f32.
    aq = agent_qs.reshape(B, N_AGENTS)
    st = states.reshape(B, STATE_DIM)

    # Row-block: large to amortize the ~0.35us per-grid-step overhead,
    # 256-granular for the MXU, clamped for small inputs, and shrunk (when the
    # problem is big enough) so dual-TensorCore chips (v7x) get >= 2 grid steps.
    bm = int(block_rows)
    bm = max(256, min(bm, _round_up(B, 256)))
    if B > 256 and _round_up(B, bm) // bm < 2:
        bm = max(256, _round_up(-(-B // 2), 256))
    B_pad = _round_up(B, bm)
    if B_pad != B:
        aq = jnp.pad(aq, ((0, B_pad - B), (0, 0)))
        st = jnp.pad(st, ((0, B_pad - B), (0, 0)))

    f32 = jnp.float32
    pad = _FUSED_PAD - _FUSED
    # Fused state-side hypernet weight/bias, zero-padded to 256 lanes.
    wcat = jnp.concatenate(
        [w1, wb, wf, wv1, jnp.zeros((STATE_DIM, pad), f32)], axis=1).astype(f32)
    bcat = jnp.concatenate(
        [b1, bb, bf, bv1, jnp.zeros((1, pad), f32)], axis=1).astype(f32)
    # Static 0/1 matrices: agent expansion (n, n*e) and group-sum (n*e, e).
    emat = jnp.repeat(jnp.eye(N_AGENTS, dtype=f32), EMBED_DIM, axis=1)   # (4, 128)
    gmat = jnp.tile(jnp.eye(EMBED_DIM, dtype=f32), (N_AGENTS, 1))        # (128, 32)
    wv2f = wv2.astype(f32)                                               # (32, 1)
    bv2f = bv2.astype(f32).reshape(1, 1)

    grid = (B_pad // bm,)

    def rows(cols):
        return pl.BlockSpec((bm, cols), lambda i: (i, 0))

    def full(shape):
        return pl.BlockSpec(shape, lambda i: (0, 0))

    out = pl.pallas_call(
        qmix_kernel,
        out_shape=jax.ShapeDtypeStruct((B_pad, 1), out_dtype),
        grid_spec=pltpu.PrefetchScalarGridSpec(
            num_scalar_prefetch=0,
            grid=grid,
            in_specs=[
                rows(N_AGENTS), rows(STATE_DIM),
                full(wcat.shape), full(bcat.shape),
                full(emat.shape), full(gmat.shape),
                full(wv2f.shape), full(bv2f.shape),
            ],
            out_specs=rows(1),
        ),
        compiler_params=pltpu.CompilerParams(
            dimension_semantics=("parallel",)),
    )(aq, st, wcat, bcat, emat, gmat, wv2f, bv2f)

    return out[:B].reshape(bs, T, 1)


def init_params(key):
    """Deterministic synthetic weights (Linear stored as (in, out); bias (1, out))."""
    ks = jax.random.split(key, 10)

    def lin(k, din, dout, scale=0.1):
        kw, kb = jax.random.split(k)
        w = scale * jax.random.normal(kw, (din, dout), jnp.float32)
        b = scale * jax.random.normal(kb, (1, dout), jnp.float32)
        return w, b

    w1, b1 = lin(ks[0], STATE_DIM, EMBED_DIM * N_AGENTS)     # hyper_w_1
    wb, bb = lin(ks[1], STATE_DIM, EMBED_DIM)                # hyper_b_1
    wf, bf = lin(ks[2], STATE_DIM, EMBED_DIM)                # hyper_w_final
    wv1, bv1 = lin(ks[3], STATE_DIM, EMBED_DIM)              # V[0]
    wv2, bv2 = lin(ks[4], EMBED_DIM, 1)                      # V[2]
    return (w1, b1, wb, bb, wf, bf, wv1, bv1, wv2, bv2)


def qmix_reference(agent_qs, states, params):
    """Pure-JAX reference mirroring the PyTorch forward."""
    (w1, b1, wb, bb, wf, bf, wv1, bv1, wv2, bv2) = params
    bs = agent_qs.shape[0]
    st = states.reshape(-1, STATE_DIM)
    aq = agent_qs.reshape(-1, 1, N_AGENTS)
    W1 = jnp.abs(st @ w1 + b1).reshape(-1, N_AGENTS, EMBED_DIM)
    B1 = (st @ wb + bb).reshape(-1, 1, EMBED_DIM)
    hidden = jax.nn.elu(jnp.einsum("bin,bne->bie", aq, W1) + B1)
    Wf = jnp.abs(st @ wf + bf).reshape(-1, EMBED_DIM, 1)
    v = (jnp.maximum(st @ wv1 + bv1, 0.0) @ wv2 + bv2).reshape(-1, 1, 1)
    y = jnp.einsum("bie,bej->bij", hidden, Wf) + v
    return y.reshape(bs, -1, 1)


if __name__ == "__main__":
    key = jax.random.PRNGKey(0)
    kp, ka, ks = jax.random.split(key, 3)

    params = init_params(kp)

    bs, T = 2, 8
    agent_qs = jax.random.normal(ka, (bs, T, N_AGENTS), jnp.float32)
    states = jax.random.normal(ks, (bs, T, STATE_DIM), jnp.float32)

    fwd = jax.jit(qmix_forward)
    q_tot = jax.block_until_ready(fwd(agent_qs, states, params))

    q_ref = qmix_reference(agent_qs, states, params)
    assert q_tot.shape == (bs, T, 1)
    err = jnp.max(jnp.abs(q_tot - q_ref))
    assert jnp.allclose(q_tot, q_ref, atol=1e-4, rtol=1e-4), f"max err {err}"

    print("KERNEL_OK")
</pallas_src>

<mosaic_0001>
module attributes {stable_mosaic.version = 11 : i64} {
  func.func @qmix_kernel(%arg0: i32, %arg1: memref<256x4xf32, #tpu.memory_space<vmem>>, %arg2: memref<256x32xf32, #tpu.memory_space<vmem>>, %arg3: memref<32x256xf32, #tpu.memory_space<vmem>>, %arg4: memref<1x256xf32, #tpu.memory_space<vmem>>, %arg5: memref<4x128xf32, #tpu.memory_space<vmem>>, %arg6: memref<128x32xf32, #tpu.memory_space<vmem>>, %arg7: memref<32x1xf32, #tpu.memory_space<vmem>>, %arg8: memref<1x1xf32, #tpu.memory_space<vmem>>, %arg9: memref<256x1xf32, #tpu.memory_space<vmem>>) attributes {dimension_semantics = [#tpu.dimension_semantics<parallel>], iteration_bounds = array<i64: 1>, scalar_prefetch = 0 : i64, scratch_operands = 0 : i64, tpu.core_type = #tpu.core_type<tc>, window_params = [{transform_indices = @transform_0, window_bounds = array<i64: 256, 4>}, {transform_indices = @transform_1, window_bounds = array<i64: 256, 32>}, {pipeline_mode = #tpu.pipeline_mode<synchronous>, transform_indices = @transform_2, window_bounds = array<i64: 32, 256>}, {pipeline_mode = #tpu.pipeline_mode<synchronous>, transform_indices = @transform_3, window_bounds = array<i64: 1, 256>}, {pipeline_mode = #tpu.pipeline_mode<synchronous>, transform_indices = @transform_4, window_bounds = array<i64: 4, 128>}, {pipeline_mode = #tpu.pipeline_mode<synchronous>, transform_indices = @transform_5, window_bounds = array<i64: 128, 32>}, {pipeline_mode = #tpu.pipeline_mode<synchronous>, transform_indices = @transform_6, window_bounds = array<i64: 32, 1>}, {pipeline_mode = #tpu.pipeline_mode<synchronous>, transform_indices = @transform_7, window_bounds = array<i64: 1, 1>}, {transform_indices = @transform_8, window_bounds = array<i64: 256, 1>}]} {
    %c0 = arith.constant 0 : index
    %c0_0 = arith.constant 0 : index
    %0 = vector.load %arg2[%c0, %c0_0] : memref<256x32xf32, #tpu.memory_space<vmem>>, vector<256x32xf32>
    %c0_1 = arith.constant 0 : index
    %c0_2 = arith.constant 0 : index
    %1 = vector.load %arg1[%c0_1, %c0_2] : memref<256x4xf32, #tpu.memory_space<vmem>>, vector<256x4xf32>
    %c0_3 = arith.constant 0 : index
    %c0_4 = arith.constant 0 : index
    %2 = vector.load %arg3[%c0_3, %c0_4] : memref<32x256xf32, #tpu.memory_space<vmem>>, vector<32x256xf32>
    %cst = arith.constant dense<0.000000e+00> : vector<256x256xf32>
    %3 = tpu.matmul %0, %2, %cst {dimension_numbers = #tpu.dot_dimension_numbers<[1], [0], [0], [1], [0, 0, 1, 1], [], []>} : vector<256x32xf32>, vector<32x256xf32>, vector<256x256xf32> -> vector<256x256xf32>
    %c0_5 = arith.constant 0 : index
    %c0_6 = arith.constant 0 : index
    %4 = vector.load %arg4[%c0_5, %c0_6] : memref<1x256xf32, #tpu.memory_space<vmem>>, vector<1x256xf32>
    %5 = vector.broadcast %4 : vector<1x256xf32> to vector<256x256xf32>
    %6 = arith.addf %3, %5 : vector<256x256xf32>
    %7 = vector.extract_strided_slice %6 {offsets = [0, 0], sizes = [256, 128], strides = [1, 1]} : vector<256x256xf32> to vector<256x128xf32>
    %8 = math.absf %7 : vector<256x128xf32>
    %9 = vector.extract_strided_slice %6 {offsets = [0, 128], sizes = [256, 32], strides = [1, 1]} : vector<256x256xf32> to vector<256x32xf32>
    %10 = vector.extract_strided_slice %6 {offsets = [0, 160], sizes = [256, 32], strides = [1, 1]} : vector<256x256xf32> to vector<256x32xf32>
    %11 = math.absf %10 : vector<256x32xf32>
    %12 = vector.extract_strided_slice %6 {offsets = [0, 192], sizes = [256, 32], strides = [1, 1]} : vector<256x256xf32> to vector<256x32xf32>
    %cst_7 = arith.constant 0.000000e+00 : f32
    %13 = vector.broadcast %cst_7 : f32 to vector<256x32xf32>
    %14 = arith.maximumf %12, %13 : vector<256x32xf32>
    %c0_8 = arith.constant 0 : index
    %c0_9 = arith.constant 0 : index
    %15 = vector.load %arg5[%c0_8, %c0_9] : memref<4x128xf32, #tpu.memory_space<vmem>>, vector<4x128xf32>
    %cst_10 = arith.constant dense<0.000000e+00> : vector<256x128xf32>
    %16 = tpu.matmul %1, %15, %cst_10 {dimension_numbers = #tpu.dot_dimension_numbers<[1], [0], [0], [1], [0, 0, 1, 1], [], []>} : vector<256x4xf32>, vector<4x128xf32>, vector<256x128xf32> -> vector<256x128xf32>
    %17 = arith.mulf %16, %8 : vector<256x128xf32>
    %c0_11 = arith.constant 0 : index
    %c0_12 = arith.constant 0 : index
    %18 = vector.load %arg6[%c0_11, %c0_12] : memref<128x32xf32, #tpu.memory_space<vmem>>, vector<128x32xf32>
    %cst_13 = arith.constant dense<0.000000e+00> : vector<256x32xf32>
    %19 = tpu.matmul %17, %18, %cst_13 {dimension_numbers = #tpu.dot_dimension_numbers<[1], [0], [0], [1], [0, 0, 1, 1], [], []>} : vector<256x128xf32>, vector<128x32xf32>, vector<256x32xf32> -> vector<256x32xf32>
    %20 = arith.addf %19, %9 : vector<256x32xf32>
    %cst_14 = arith.constant 0.000000e+00 : f32
    %21 = vector.broadcast %cst_14 : f32 to vector<256x32xf32>
    %22 = arith.cmpf ogt, %20, %21 : vector<256x32xf32>
    %cst_15 = arith.constant 0.000000e+00 : f32
    %23 = vector.broadcast %cst_15 : f32 to vector<256x32xf32>
    %24 = arith.minimumf %20, %23 : vector<256x32xf32>
    %25 = math.exp %24 : vector<256x32xf32>
    %cst_16 = arith.constant 1.000000e+00 : f32
    %26 = vector.broadcast %cst_16 : f32 to vector<256x32xf32>
    %27 = arith.subf %25, %26 : vector<256x32xf32>
    %28 = arith.select %22, %20, %27 : vector<256x32xi1>, vector<256x32xf32>
    %29 = arith.mulf %28, %11 : vector<256x32xf32>
    %cst_17 = arith.constant dense<0.000000e+00> : vector<256xf32>
    %30 = vector.multi_reduction <add>, %29, %cst_17 [1] : vector<256x32xf32> to vector<256xf32>
    %31 = vector.shape_cast %30 : vector<256xf32> to vector<256x1xf32>
    %c0_18 = arith.constant 0 : index
    %c0_19 = arith.constant 0 : index
    %32 = vector.load %arg7[%c0_18, %c0_19] : memref<32x1xf32, #tpu.memory_space<vmem>>, vector<32x1xf32>
    %cst_20 = arith.constant dense<0.000000e+00> : vector<256x1xf32>
    %33 = tpu.matmul %14, %32, %cst_20 {dimension_numbers = #tpu.dot_dimension_numbers<[1], [0], [0], [1], [0, 0, 1, 1], [], []>} : vector<256x32xf32>, vector<32x1xf32>, vector<256x1xf32> -> vector<256x1xf32>
    %34 = arith.addf %31, %33 : vector<256x1xf32>
    %c0_21 = arith.constant 0 : index
    %c0_22 = arith.constant 0 : index
    %35 = vector.load %arg8[%c0_21, %c0_22] : memref<1x1xf32, #tpu.memory_space<vmem>>, vector<1x1xf32>
    %36 = vector.broadcast %35 : vector<1x1xf32> to vector<256x1xf32>
    %37 = arith.addf %34, %36 : vector<256x1xf32>
    %c0_23 = arith.constant 0 : index
    %c0_24 = arith.constant 0 : index
    %38 = vector.load %arg9[%c0_23, %c0_24] : memref<256x1xf32, #tpu.memory_space<vmem>>, vector<256x1xf32>
    tpu.vector_store %arg9[%c0_23, %c0_24], %37 {strides = array<i32>} : memref<256x1xf32, #tpu.memory_space<vmem>>, vector<256x1xf32>,
    return
  }
  func.func @transform_0(%arg0: i32) -> (i32, i32) {
    %c0_i32 = arith.constant 0 : i32
    %c0_i32_0 = arith.constant 0 : i32
    return %arg0, %c0_i32 : i32, i32
  }
  func.func @transform_1(%arg0: i32) -> (i32, i32) {
    %c0_i32 = arith.constant 0 : i32
    %c0_i32_0 = arith.constant 0 : i32
    return %arg0, %c0_i32 : i32, i32
  }
  func.func @transform_2(%arg0: i32) -> (i32, i32) {
    %c0_i32 = arith.constant 0 : i32
    %c0_i32_0 = arith.constant 0 : i32
    %c0_i32_1 = arith.constant 0 : i32
    return %c0_i32, %c0_i32_0 : i32, i32
  }
  func.func @transform_3(%arg0: i32) -> (i32, i32) {
    %c0_i32 = arith.constant 0 : i32
    %c0_i32_0 = arith.constant 0 : i32
    %c0_i32_1 = arith.constant 0 : i32
    return %c0_i32, %c0_i32_0 : i32, i32
  }
  func.func @transform_4(%arg0: i32) -> (i32, i32) {
    %c0_i32 = arith.constant 0 : i32
    %c0_i32_0 = arith.constant 0 : i32
    %c0_i32_1 = arith.constant 0 : i32
    return %c0_i32, %c0_i32_0 : i32, i32
  }
  func.func @transform_5(%arg0: i32) -> (i32, i32) {
    %c0_i32 = arith.constant 0 : i32
    %c0_i32_0 = arith.constant 0 : i32
    %c0_i32_1 = arith.constant 0 : i32
    return %c0_i32, %c0_i32_0 : i32, i32
  }
  func.func @transform_6(%arg0: i32) -> (i32, i32) {
    %c0_i32 = arith.constant 0 : i32
    %c0_i32_0 = arith.constant 0 : i32
    %c0_i32_1 = arith.constant 0 : i32
    return %c0_i32, %c0_i32_0 : i32, i32
  }
  func.func @transform_7(%arg0: i32) -> (i32, i32) {
    %c0_i32 = arith.constant 0 : i32
    %c0_i32_0 = arith.constant 0 : i32
    %c0_i32_1 = arith.constant 0 : i32
    return %c0_i32, %c0_i32_0 : i32, i32
  }
  func.func @transform_8(%arg0: i32) -> (i32, i32) {
    %c0_i32 = arith.constant 0 : i32
    %c0_i32_0 = arith.constant 0 : i32
    return %arg0, %c0_i32 : i32, i32
  }
}

</mosaic_0001>

<bundles_post_ra>
// kernel: qmix_forward.1
= control target key start
LH: loop header
LB: loop body
LE: loop exit
PB: predicated region body
PF: predicated region fallthrough
CT: control target
= control target key end

     0   :  { %v2612_v3 = vmov 0.0   ;;  %vm663_vm0 = vcmask 1043456   ;;  %vm115_vm1 = vcmask 261120   ;;  %vm566_vm2 = vcmask 31744   ;;  %s2613_s30 = smov 64   ;;  %s2614_s9 = smov 96   ;;  %s3958_s2 = inlined_call_operand.vmem [shape: f32[32,256], index: 2, kind: input, shape index: {}]   ;;  %s3959_s4 = inlined_call_operand.vmem [shape: f32[4,128], index: 4, kind: input, shape index: {}]   ;;  %s3960_s1 = inlined_call_operand.vmem [shape: f32[256,32], index: 1, kind: input, shape index: {}]   ;;  %s3961_s0 = inlined_call_operand.vmem [shape: f32[256,4], index: 0, kind: input, shape index: {}]   ;;  %s3962_s3 = inlined_call_operand.vmem [shape: f32[1,256], index: 3, kind: input, shape index: {}]   ;;  %s3963_s5 = inlined_call_operand.vmem [shape: f32[128,32], index: 5, kind: input, shape index: {}]   ;;  %s3964_s6 = inlined_call_operand.vmem [shape: f32[32,1], index: 6, kind: input, shape index: {}]   ;;  %s3965_s7 = inlined_call_operand.<no memory space> [shape: f32[1,1], index: 7, kind: input, shape index: {}]   ;;  %s3966_s8 = inlined_call_operand.vmem [shape: f32[256,1], index: 8, kind: output, shape index: {}]  }
   0x1   :  { %v102_v0 = vld [vmem:[%s3958_s2 + $0x38] sm:$0xff]  ;;  %v101_v1 = vld [vmem:[%s3958_s2 + $0x30] sm:$0xff]  ;;  %v100_v2 = vld [vmem:[%s3958_s2 + $0x28] sm:$0xff]  ;;  %276 = vmatprep.mubr.f32.mxu0 %v2612_v3  ;;  %v105_v31 = vlaneseq }
   0x2   :  { %236 = vmatprep.subr.mxu0 %v102_v0  ;;  %v99_v4 = vld [vmem:[%s3958_s2 + $0x20] sm:$0xff]  ;;  %v98_v5 = vld [vmem:[%s3958_s2 + $0x18] sm:$0xff]  ;;  %v97_v6 = vld [vmem:[%s3958_s2 + $0x10] sm:$0xff] }
   0x3   :  { %237 = vmatpush1.msra.mxu0 %v101_v1  ;;  %v565_v7 = vld [vmem:[%s3959_s4] sm:$0xf]  ;;  %v96_v8 = vld [vmem:[%s3958_s2 + $0x8] sm:$0xff]  ;;  %v77_v11 = vld [vmem:[%s3961_s0 + $0x70] sm:$0xff]  ;;  %v2788_v34 = vshrl.u32 %v105_v31, 7 }
   0x4   :  { %238 = vmatprep.subr.mxu0 %v100_v2  ;;  %2543 = vmatprep.subr.msk.mxu1 %vm663_vm0, %v565_v7  ;;  %v95_v9 = vld [vmem:[%s3958_s2] sm:$0xff]  ;;  %v78_v12 = vld [vmem:[%s3961_s0 + $0x78] sm:$0xff]  ;;  %v32_v13 = vld [vmem:[%s3960_s1 + $0x8] sm:$0xff] }
   0x5   :  { %239 = vmatpush1.msra.mxu0 %v99_v4  ;;  %2544 = vmatpush3.msk.msra.mxu1 %vm663_vm0, %v565_v7  ;;  %v31_v10 = vld [vmem:[%s3960_s1] sm:$0xff]  ;;  %v80_v15 = vld [vmem:[%s3961_s0 + $0x88] sm:$0xff]  ;;  %v33_v16 = vld [vmem:[%s3960_s1 + $0x10] sm:$0xff]  ;;  %v107_v37 = vsub.s32 0, %v2788_v34 }
   0x6   :  { %240 = vmatprep.subr.mxu0 %v98_v5  ;;  %v79_v14 = vld [vmem:[%s3961_s0 + $0x80] sm:$0xff]  ;;  %2380 = vmatprep.mubr.msk.f32.mxu1 %vm566_vm2, %v77_v11  ;;  %v81_v17 = vld [vmem:[%s3961_s0 + $0x90] sm:$0xff]  ;;  %v82_v18 = vld [vmem:[%s3961_s0 + $0x98] sm:$0xff] }
   0x7   :  { %241 = vmatpush1.msra.mxu0 %v97_v6  ;;  %2381 = vmatmul.mubr.msk.f32.vlgmr.msra.gmra.mxu1 %vm566_vm2, %v78_v12  ;;  %v34_v19 = vld [vmem:[%s3960_s1 + $0x18] sm:$0xff]  ;;  %v83_v20 = vld [vmem:[%s3961_s0 + $0xa0] sm:$0xff]  ;;  %v84_v21 = vld [vmem:[%s3961_s0 + $0xa8] sm:$0xff] }
   0x8   :  { %242 = vmatprep.subr.mxu0 %v96_v8  ;;  %2383 = vmatprep.mubr.msk.f32.mxu1 %vm566_vm2, %v79_v14  ;;  %v35_v22 = vld [vmem:[%s3960_s1 + $0x20] sm:$0xff]  ;;  %v85_v23 = vld [vmem:[%s3961_s0 + $0xb0] sm:$0xff]  ;;  %v86_v24 = vld [vmem:[%s3961_s0 + $0xb8] sm:$0xff] }
   0x9   :  { %243 = vmatpush1.msra.mxu0 %v95_v9  ;;  %v36_v25 = vld [vmem:[%s3960_s1 + $0x28] sm:$0xff]  ;;  %v87_v26 = vld [vmem:[%s3961_s0 + $0xc0] sm:$0xff]  ;;  %v37_v28 = vld [vmem:[%s3960_s1 + $0x30] sm:$0xff] }
   0xa   :  { %2110 = vmatmul.mubr.msk.f32.vlgmr.msra.gmra.mxu0 %vm115_vm1, %v31_v10  ;;  %2357 = vmatprep.subr.msk.mxu0 %vm663_vm0, %v565_v7  ;;  %v88_v27 = vld [vmem:[%s3961_s0 + $0xc8] sm:$0xff]  ;;  %v89_v29 = vld [vmem:[%s3961_s0 + $0xd0] sm:$0xff]  ;;  %v90_v30 = vld [vmem:[%s3961_s0 + $0xd8] sm:$0xff] }
   0xb   :  { %2358 = vmatpush3.msk.msra.mxu0 %vm663_vm0, %v565_v7  ;;  %282 = vmatprep.mubr.f32.mxu0 %v2612_v3  ;;  %v38_v32 = vld [vmem:[%s3960_s1 + $0x38] sm:$0xff]  ;;  %v91_v33 = vld [vmem:[%s3961_s0 + $0xe0] sm:$0xff]  ;;  %v92_v36 = vld [vmem:[%s3961_s0 + $0xe8] sm:$0xff] }
   0xc   :  { %2384 = vmatmul.mubr.msk.f32.gmra.mxu1 %vm566_vm2, %v80_v15  ;;  %v2794_v35 = vld [vmem:[%s3962_s3] sm:$0x3]  ;;  %v93_v39 = vld [vmem:[%s3961_s0 + $0xf0] sm:$0xff]  ;;  %v94_v41 = vld [vmem:[%s3961_s0 + $0xf8] sm:$0xff] }
   0xd   :  { %2386 = vmatprep.mubr.msk.f32.mxu1 %vm566_vm2, %v81_v17  ;;  %v39_v38 = vld [vmem:[%s3960_s1 + $0x40] sm:$0xff]  ;;  %v2810_v40 = vrot.slane %v2794_v35, %v107_v37  ;;  %v40_v42 = vld [vmem:[%s3960_s1 + $0x48] sm:$0xff]  ;;  %v41_v43 = vld [vmem:[%s3960_s1 + $0x50] sm:$0xff] }
   0xe   :  { %2111 = vmatmul.mubr.msk.f32.gmra.mxu0 %vm115_vm1, %v32_v13  ;;  %v42_v44 = vld [vmem:[%s3960_s1 + $0x58] sm:$0xff]  ;;  %v43_v45 = vld [vmem:[%s3960_s1 + $0x60] sm:$0xff]  ;;  %v44_v46 = vld [vmem:[%s3960_s1 + $0x68] sm:$0xff] }
   0xf   :  { %288 = vmatprep.mubr.f32.mxu0 %v2612_v3  ;;  %3985 = vst [vmem:[#allocation3_spill] sm:$0xff] %v2810_v40  ;;  %v45_v47 = vld [vmem:[%s3960_s1 + $0x70] sm:$0xff]  ;;  %v46_v48 = vld [vmem:[%s3960_s1 + $0x78] sm:$0xff]  ;;  %v47_v49 = vld [vmem:[%s3960_s1 + $0x80] sm:$0xff] }
  0x10   :  { %2387 = vmatmul.mubr.msk.f32.gmra.mxu1 %vm566_vm2, %v82_v18  ;;  %v48_v50 = vld [vmem:[%s3960_s1 + $0x88] sm:$0xff]  ;;  %v49_v51 = vld [vmem:[%s3960_s1 + $0x90] sm:$0xff]  ;;  %v50_v52 = vld [vmem:[%s3960_s1 + $0x98] sm:$0xff] }
  0x11   :  { %2389 = vmatprep.mubr.msk.f32.mxu1 %vm566_vm2, %v83_v20  ;;  %v51_v53 = vld [vmem:[%s3960_s1 + $0xa0] sm:$0xff]  ;;  %v52_v54 = vld [vmem:[%s3960_s1 + $0xa8] sm:$0xff]  ;;  %v53_v55 = vld [vmem:[%s3960_s1 + $0xb0] sm:$0xff] }
  0x12   :  { %2112 = vmatmul.mubr.msk.f32.gmra.mxu0 %vm115_vm1, %v33_v16  ;;  %v54_v56 = vld [vmem:[%s3960_s1 + $0xb8] sm:$0xff]  ;;  %v55_v57 = vld [vmem:[%s3960_s1 + $0xc0] sm:$0xff]  ;;  %v56_v58 = vld [vmem:[%s3960_s1 + $0xc8] sm:$0xff] }
  0x13   :  { %294 = vmatprep.mubr.f32.mxu0 %v2612_v3  ;;  %v57_v59 = vld [vmem:[%s3960_s1 + $0xd0] sm:$0xff]  ;;  %v58_v60 = vld [vmem:[%s3960_s1 + $0xd8] sm:$0xff]  ;;  %v59_v61 = vld [vmem:[%s3960_s1 + $0xe0] sm:$0xff] }
  0x14   :  { %2390 = vmatmul.mubr.msk.f32.gmra.mxu1 %vm566_vm2, %v84_v21  ;;  %v60_v62 = vld [vmem:[%s3960_s1 + $0xe8] sm:$0xff]  ;;  %v61_v63 = vld [vmem:[%s3960_s1 + $0xf0] sm:$0xff]  ;;  %v62_v0 = vld [vmem:[%s3960_s1 + $0xf8] sm:$0xff] }
  0x15   :  { %2392 = vmatprep.mubr.msk.f32.mxu1 %vm566_vm2, %v85_v23  ;;  %v63_v1 = vld [vmem:[%s3961_s0] sm:$0xff]  ;;  %v64_v2 = vld [vmem:[%s3961_s0 + $0x8] sm:$0xff]  ;;  %v66_v4 = vld [vmem:[%s3961_s0 + $0x18] sm:$0xff] }
  0x16   :  { %2113 = vmatmul.mubr.msk.f32.gmra.mxu0 %vm115_vm1, %v34_v19  ;;  %v67_v5 = vld [vmem:[%s3961_s0 + $0x20] sm:$0xff]  ;;  %v68_v6 = vld [vmem:[%s3961_s0 + $0x28] sm:$0xff]  ;;  %v69_v7 = vld [vmem:[%s3961_s0 + $0x30] sm:$0xff] }
  0x17   :  { %300 = vmatprep.mubr.f32.mxu0 %v2612_v3  ;;  %v70_v8 = vld [vmem:[%s3961_s0 + $0x38] sm:$0xff]  ;;  %v71_v9 = vld [vmem:[%s3961_s0 + $0x40] sm:$0xff]  ;;  %v72_v10 = vld [vmem:[%s3961_s0 + $0x48] sm:$0xff] }
  0x18   :  { %2393 = vmatmul.mubr.msk.f32.gmra.mxu1 %vm566_vm2, %v86_v24  ;;  %v73_v11 = vld [vmem:[%s3961_s0 + $0x50] sm:$0xff]  ;;  %v74_v12 = vld [vmem:[%s3961_s0 + $0x58] sm:$0xff]  ;;  %v75_v13 = vld [vmem:[%s3961_s0 + $0x60] sm:$0xff] }
  0x19   :  { %2395 = vmatprep.mubr.msk.f32.mxu1 %vm566_vm2, %v87_v26  ;;  %v76_v14 = vld [vmem:[%s3961_s0 + $0x68] sm:$0xff]  ;;  %v939_v15 = vld [vmem:[%s3963_s5 + $0x78] sm:$0xff]  ;;  %v938_v16 = vld [vmem:[%s3963_s5 + $0x70] sm:$0xff]  ;;  %v111_v26 = vsub.s32 1, %v2788_v34 }
  0x1a   :  { %2114 = vmatmul.mubr.msk.f32.gmra.mxu0 %vm115_vm1, %v35_v22  ;;  %2407 = vmatprep.subr.mxu1 %v939_v15  ;;  %v937_v17 = vld [vmem:[%s3963_s5 + $0x68] sm:$0xff]  ;;  %v936_v18 = vld [vmem:[%s3963_s5 + $0x60] sm:$0xff]  ;;  %v935_v19 = vld [vmem:[%s3963_s5 + $0x58] sm:$0xff] }
  0x1b   :  { %306 = vmatprep.mubr.f32.mxu0 %v2612_v3  ;;  %2408 = vmatpush3.msra.mxu1 %v939_v15  ;;  %v934_v20 = vld [vmem:[%s3963_s5 + $0x50] sm:$0xff]  ;;  %v933_v21 = vld [vmem:[%s3963_s5 + $0x48] sm:$0xff]  ;;  %v932_v22 = vld [vmem:[%s3963_s5 + $0x40] sm:$0xff] }
  0x1c   :  { %2396 = vmatmul.mubr.msk.f32.gmra.mxu1 %vm566_vm2, %v88_v27  ;;  %2409 = vmatprep.subr.mxu1 %v938_v16  ;;  %v931_v23 = vld [vmem:[%s3963_s5 + $0x38] sm:$0xff]  ;;  %v930_v24 = vld [vmem:[%s3963_s5 + $0x30] sm:$0xff]  ;;  %v928_v27 = vld [vmem:[%s3963_s5 + $0x20] sm:$0xff] }
  0x1d   :  { %2398 = vmatprep.mubr.msk.f32.mxu1 %vm566_vm2, %v89_v29  ;;  %2410 = vmatpush3.msra.mxu1 %v938_v16  ;;  %v3031_v29 = vrot.slane %v2794_v35, %v111_v26 }
  0x1e   :  { %2115 = vmatmul.mubr.msk.f32.gmra.mxu0 %vm115_vm1, %v36_v25  ;;  %2411 = vmatprep.subr.mxu1 %v937_v17  ;;  %v929_v25 = vld [vmem:[%s3963_s5 + $0x28] sm:$0xff] }
  0x1f   :  { %312 = vmatprep.mubr.f32.mxu0 %v2612_v3  ;;  %2412 = vmatpush3.msra.mxu1 %v937_v17 }
  0x20   :  { %2399 = vmatmul.mubr.msk.f32.gmra.mxu1 %vm566_vm2, %v90_v30  ;;  %2413 = vmatprep.subr.mxu1 %v936_v18  ;;  %v926_v30 = vld [vmem:[%s3963_s5 + $0x10] sm:$0xff] }
  0x21   :  { %2401 = vmatprep.mubr.msk.f32.mxu1 %vm566_vm2, %v91_v33  ;;  %2414 = vmatpush3.msra.mxu1 %v936_v18  ;;  %v925_v33 = vld [vmem:[%s3963_s5 + $0x8] sm:$0xff] }
  0x22   :  { %2116 = vmatmul.mubr.msk.f32.gmra.mxu0 %vm115_vm1, %v37_v28  ;;  %2415 = vmatprep.subr.mxu1 %v935_v19  ;;  %v927_v28 = vld [vmem:[%s3963_s5 + $0x18] sm:$0xff] }
  0x23   :  { %318 = vmatprep.mubr.f32.mxu0 %v2612_v3  ;;  %2416 = vmatpush3.msra.mxu1 %v935_v19 }
  0x24   :  { %2402 = vmatmul.mubr.msk.f32.gmra.mxu1 %vm566_vm2, %v92_v36  ;;  %2417 = vmatprep.subr.mxu1 %v934_v20  ;;  %v924_v36 = vld [vmem:[%s3963_s5] sm:$0xff] }
  0x25   :  { %2404 = vmatprep.mubr.msk.f32.mxu1 %vm566_vm2, %v93_v39  ;;  %2418 = vmatpush3.msra.mxu1 %v934_v20 }
  0x26   :  { %2117 = vmatmul.mubr.msk.f32.gmra.mxu0 %vm115_vm1, %v38_v32  ;;  %2419 = vmatprep.subr.mxu1 %v933_v21 }
  0x27   :  { %324 = vmatprep.mubr.f32.mxu0 %v2612_v3  ;;  %2420 = vmatpush3.msra.mxu1 %v933_v21 }
  0x28   :  { %2405 = vmatmul.mubr.msk.f32.gmra.mxu1 %vm566_vm2, %v94_v41  ;;  %2421 = vmatprep.subr.mxu1 %v932_v22 }
  0x29   :  { %2422 = vmatpush3.msra.mxu1 %v932_v22 }
  0x2a   :  { %2118 = vmatmul.mubr.msk.f32.gmra.mxu0 %vm115_vm1, %v39_v38  ;;  %2423 = vmatprep.subr.mxu1 %v931_v23 }
  0x2b   :  { %330 = vmatprep.mubr.f32.mxu0 %v2612_v3  ;;  %2424 = vmatpush3.msra.mxu1 %v931_v23 }
  0x2c   :  { %2425 = vmatprep.subr.mxu1 %v930_v24 }
  0x2d   :  { %2426 = vmatpush3.msra.mxu1 %v930_v24 }
  0x2e   :  { %2119 = vmatmul.mubr.msk.f32.gmra.mxu0 %vm115_vm1, %v40_v42  ;;  %2427 = vmatprep.subr.mxu1 %v929_v25 }
  0x2f   :  { %336 = vmatprep.mubr.f32.mxu0 %v2612_v3  ;;  %2428 = vmatpush3.msra.mxu1 %v929_v25 }
  0x30   :  { %2429 = vmatprep.subr.mxu1 %v928_v27 }
  0x31   :  { %2430 = vmatpush3.msra.mxu1 %v928_v27 }
  0x32   :  { %2120 = vmatmul.mubr.msk.f32.gmra.mxu0 %vm115_vm1, %v41_v43  ;;  %2431 = vmatprep.subr.mxu1 %v927_v28 }
  0x33   :  { %342 = vmatprep.mubr.f32.mxu0 %v2612_v3  ;;  %2432 = vmatpush3.msra.mxu1 %v927_v28 }
  0x34   :  { %2433 = vmatprep.subr.mxu1 %v926_v30 }
  0x35   :  { %2434 = vmatpush3.msra.mxu1 %v926_v30 }
  0x36   :  { %2121 = vmatmul.mubr.msk.f32.gmra.mxu0 %vm115_vm1, %v42_v44  ;;  %2435 = vmatprep.subr.mxu1 %v925_v33 }
  0x37   :  { %348 = vmatprep.mubr.f32.mxu0 %v2612_v3  ;;  %2436 = vmatpush3.msra.mxu1 %v925_v33 }
  0x38   :  { %2437 = vmatprep.subr.mxu1 %v924_v36 }
  0x39   :  { %2438 = vmatpush3.msra.mxu1 %v924_v36 }
  0x3a   :  { %2122 = vmatmul.mubr.msk.f32.gmra.mxu0 %vm115_vm1, %v43_v45 }
  0x3b   :  { %354 = vmatprep.mubr.f32.mxu0 %v2612_v3 }
  0x3e   :  { %2123 = vmatmul.mubr.msk.f32.gmra.mxu0 %vm115_vm1, %v44_v46 }
  0x3f   :  { %360 = vmatprep.mubr.f32.mxu0 %v2612_v3 }
  0x42   :  { %2124 = vmatmul.mubr.msk.f32.gmra.mxu0 %vm115_vm1, %v45_v47 }
  0x43   :  { %366 = vmatprep.mubr.f32.mxu0 %v2612_v3 }
  0x46   :  { %2125 = vmatmul.mubr.msk.f32.gmra.mxu0 %vm115_vm1, %v46_v48 }
  0x47   :  { %372 = vmatprep.mubr.f32.mxu0 %v2612_v3 }
  0x4a   :  { %2126 = vmatmul.mubr.msk.f32.gmra.mxu0 %vm115_vm1, %v47_v49 }
  0x4b   :  { %378 = vmatprep.mubr.f32.mxu0 %v2612_v3 }
  0x4e   :  { %2127 = vmatmul.mubr.msk.f32.gmra.mxu0 %vm115_vm1, %v48_v50 }
  0x4f   :  { %384 = vmatprep.mubr.f32.mxu0 %v2612_v3 }
  0x52   :  { %2128 = vmatmul.mubr.msk.f32.gmra.mxu0 %vm115_vm1, %v49_v51 }
  0x53   :  { %390 = vmatprep.mubr.f32.mxu0 %v2612_v3 }
  0x56   :  { %2129 = vmatmul.mubr.msk.f32.gmra.mxu0 %vm115_vm1, %v50_v52 }
  0x57   :  { %396 = vmatprep.mubr.f32.mxu0 %v2612_v3 }
  0x5a   :  { %2130 = vmatmul.mubr.msk.f32.gmra.mxu0 %vm115_vm1, %v51_v53 }
  0x5b   :  { %402 = vmatprep.mubr.f32.mxu0 %v2612_v3 }
  0x5e   :  { %2131 = vmatmul.mubr.msk.f32.gmra.mxu0 %vm115_vm1, %v52_v54 }
  0x5f   :  { %408 = vmatprep.mubr.f32.mxu0 %v2612_v3 }
  0x62   :  { %2132 = vmatmul.mubr.msk.f32.gmra.mxu0 %vm115_vm1, %v53_v55 }
  0x63   :  { %414 = vmatprep.mubr.f32.mxu0 %v2612_v3 }
  0x66   :  { %2133 = vmatmul.mubr.msk.f32.gmra.mxu0 %vm115_vm1, %v54_v56 }
  0x67   :  { %420 = vmatprep.mubr.f32.mxu0 %v2612_v3 }
  0x6a   :  { %2134 = vmatmul.mubr.msk.f32.gmra.mxu0 %vm115_vm1, %v55_v57 }
  0x6b   :  { %426 = vmatprep.mubr.f32.mxu0 %v2612_v3 }
  0x6e   :  { %2135 = vmatmul.mubr.msk.f32.gmra.mxu0 %vm115_vm1, %v56_v58 }
  0x6f   :  { %432 = vmatprep.mubr.f32.mxu0 %v2612_v3 }
  0x72   :  { %2136 = vmatmul.mubr.msk.f32.gmra.mxu0 %vm115_vm1, %v57_v59 }
  0x73   :  { %438 = vmatprep.mubr.f32.mxu0 %v2612_v3 }
  0x76   :  { %2137 = vmatmul.mubr.msk.f32.gmra.mxu0 %vm115_vm1, %v58_v60 }
  0x77   :  { %444 = vmatprep.mubr.f32.mxu0 %v2612_v3 }
  0x7a   :  { %2138 = vmatmul.mubr.msk.f32.gmra.mxu0 %vm115_vm1, %v59_v61 }
  0x7b   :  { %450 = vmatprep.mubr.f32.mxu0 %v2612_v3 }
  0x7e   :  { %2139 = vmatmul.mubr.msk.f32.gmra.mxu0 %vm115_vm1, %v60_v62 }
  0x7f   :  { %456 = vmatprep.mubr.f32.mxu0 %v2612_v3 }
  0x82   :  { %2140 = vmatmul.mubr.msk.f32.gmra.mxu0 %vm115_vm1, %v61_v63 }
  0x83   :  { %462 = vmatprep.mubr.f32.mxu0 %v2612_v3  ;;  %v65_v3 = vld [vmem:[%s3961_s0 + $0x10] sm:$0xff] }
  0x86   :  { %2141 = vmatmul.mubr.msk.f32.gmra.mxu0 %vm115_vm1, %v62_v0 }
  0x87   :  { %2359 = vmatprep.mubr.msk.f32.mxu0 %vm566_vm2, %v63_v1 }
  0x8a   :  { %2360 = vmatmul.mubr.msk.f32.vlgmr.msra.gmra.mxu0 %vm566_vm2, %v64_v2 }
  0x8b   :  { %2362 = vmatprep.mubr.msk.f32.mxu0 %vm566_vm2, %v65_v3 }
  0x8e   :  { %2363 = vmatmul.mubr.msk.f32.gmra.mxu0 %vm566_vm2, %v66_v4 }
  0x8f   :  { %2365 = vmatprep.mubr.msk.f32.mxu0 %vm566_vm2, %v67_v5 }
  0x92   :  { %2366 = vmatmul.mubr.msk.f32.gmra.mxu0 %vm566_vm2, %v68_v6 }
  0x93   :  { %2368 = vmatprep.mubr.msk.f32.mxu0 %vm566_vm2, %v69_v7 }
  0x96   :  { %2369 = vmatmul.mubr.msk.f32.gmra.mxu0 %vm566_vm2, %v70_v8 }
  0x97   :  { %2371 = vmatprep.mubr.msk.f32.mxu0 %vm566_vm2, %v71_v9 }
  0x9a   :  { %2372 = vmatmul.mubr.msk.f32.gmra.mxu0 %vm566_vm2, %v72_v10 }
  0x9b   :  { %2374 = vmatprep.mubr.msk.f32.mxu0 %vm566_vm2, %v73_v11 }
  0x9e   :  { %2375 = vmatmul.mubr.msk.f32.gmra.mxu0 %vm566_vm2, %v74_v12 }
  0x9f   :  { %2377 = vmatprep.mubr.msk.f32.mxu0 %vm566_vm2, %v75_v13 }
  0xa2   :  { %2378 = vmatmul.mubr.msk.f32.gmra.mxu0 %vm566_vm2, %v76_v14 }
  0xca   :  { %v278_v31 = vpop.f32.mrf.mxu0 }
  0xcb   :  { %v3037_v32 = vadd.f32 %v278_v31, %v2810_v40 }
  0xcc   :  { %v280_v34 = vpop.f32.mrf.mxu0 }
  0xcd   :  { %v3043_v35 = vadd.f32 %v280_v34, %v3031_v29 }
  0xce   :  { %v284_v37 = vpop.f32.mrf.mxu0 }
  0xcf   :  { %3986 = vst [vmem:[#allocation4_spill] sm:$0xff] %v3043_v35  ;;  %v3049_v38 = vadd.f32 %v284_v37, %v2810_v40  ;;  %v533_v39 = vmax.f32 %v3043_v35, 0.0 }
  0xd0   :  { %v286_v41 = vpop.f32.mrf.mxu0 }
  0xd1   :  { %v3053_v42 = vadd.f32 %v286_v41, %v3031_v29  ;;  %1649 = vrot.lane.b32.xlu0 %v533_v39, %s2613_s30 }
  0xd2   :  { %v290_v43 = vpop.f32.mrf.mxu0 }
  0xd3   :  { %v3057_v44 = vadd.f32 %v290_v43, %v2810_v40  ;;  %v534_v45 = vmax.f32 %v3053_v42, 0.0 }
  0xd4   :  { %v292_v46 = vpop.f32.mrf.mxu0 }
  0xd5   :  { %v3061_v47 = vadd.f32 %v292_v46, %v3031_v29  ;;  %1651 = vrot.lane.b32.xlu0 %v534_v45, %s2613_s30 }
  0xd6   :  { %v296_v48 = vpop.f32.mrf.mxu0 }
  0xd7   :  { %v3065_v49 = vadd.f32 %v296_v48, %v2810_v40  ;;  %v535_v50 = vmax.f32 %v3061_v47, 0.0 }
  0xd8   :  { %v298_v51 = vpop.f32.mrf.mxu0 }
  0xd9   :  { %v3069_v52 = vadd.f32 %v298_v51, %v3031_v29  ;;  %1653 = vrot.lane.b32.xlu1 %v535_v50, %s2613_s30 }
  0xda   :  { %v302_v53 = vpop.f32.mrf.mxu0 }
  0xdb   :  { %v3073_v54 = vadd.f32 %v302_v53, %v2810_v40  ;;  %v536_v55 = vmax.f32 %v3069_v52, 0.0 }
  0xdc   :  { %v304_v56 = vpop.f32.mrf.mxu0 }
  0xdd   :  { %v3077_v57 = vadd.f32 %v304_v56, %v3031_v29  ;;  %1655 = vrot.lane.b32.xlu1 %v536_v55, %s2613_s30 }
  0xde   :  { %v308_v58 = vpop.f32.mrf.mxu0 }
  0xdf   :  { %v3081_v59 = vadd.f32 %v308_v58, %v2810_v40  ;;  %v537_v60 = vmax.f32 %v3077_v57, 0.0 }
  0xe0   :  { %v310_v61 = vpop.f32.mrf.mxu0 }
  0xe1   :  { %v3085_v62 = vadd.f32 %v310_v61, %v3031_v29  ;;  %1657 = vrot.lane.b32.xlu0 %v537_v60, %s2613_s30  ;;  %v3167_v61 = vld [vmem:[%s3964_s6 + $0x18] sm:$0xff] }
  0xe2   :  { %v314_v63 = vpop.f32.mrf.mxu0  ;;  %2487 = vmatprep.subr.mxu1 %v3167_v61 }
  0xe3   :  { %v3089_v0 = vadd.f32 %v314_v63, %v2810_v40  ;;  %v538_v1 = vmax.f32 %v3085_v62, 0.0 }
  0xe4   :  { %v316_v2 = vpop.f32.mrf.mxu0 }
  0xe5   :  { %v3093_v3 = vadd.f32 %v316_v2, %v3031_v29  ;;  %1659 = vrot.lane.b32.xlu1 %v538_v1, %s2613_s30 }
  0xe6   :  { %v320_v4 = vpop.f32.mrf.mxu0 }
  0xe7   :  { %v3097_v5 = vadd.f32 %v320_v4, %v2810_v40  ;;  %v539_v6 = vmax.f32 %v3093_v3, 0.0 }
  0xe8   :  { %v322_v7 = vpop.f32.mrf.mxu0 }
  0xe9   :  { %v3101_v8 = vadd.f32 %v322_v7, %v3031_v29  ;;  %1661 = vrot.lane.b32.xlu0 %v539_v6, %s2613_s30 }
  0xea   :  { %v326_v9 = vpop.f32.mrf.mxu0 }
  0xeb   :  { %v3105_v10 = vadd.f32 %v326_v9, %v2810_v40  ;;  %v540_v11 = vmax.f32 %v3101_v8, 0.0 }
  0xec   :  { %v328_v12 = vpop.f32.mrf.mxu0 }
  0xed   :  { %v3109_v13 = vadd.f32 %v328_v12, %v3031_v29  ;;  %1663 = vrot.lane.b32.xlu1 %v540_v11, %s2613_s30 }
  0xee   :  { %v332_v14 = vpop.f32.mrf.mxu0 }
  0xef   :  { %v3113_v15 = vadd.f32 %v332_v14, %v2810_v40  ;;  %v541_v16 = vmax.f32 %v3109_v13, 0.0 }
  0xf0   :  { %v334_v17 = vpop.f32.mrf.mxu0 }
  0xf1   :  { %v3117_v18 = vadd.f32 %v334_v17, %v3031_v29  ;;  %1665 = vrot.lane.b32.xlu0 %v541_v16, %s2613_s30 }
  0xf2   :  { %v338_v19 = vpop.f32.mrf.mxu0 }
  0xf3   :  { %v3121_v20 = vadd.f32 %v338_v19, %v2810_v40  ;;  %v542_v21 = vmax.f32 %v3117_v18, 0.0 }
  0xf4   :  { %v340_v22 = vpop.f32.mrf.mxu0 }
  0xf5   :  { %v3125_v23 = vadd.f32 %v340_v22, %v3031_v29  ;;  %1667 = vrot.lane.b32.xlu1 %v542_v21, %s2613_s30 }
  0xf6   :  { %v344_v24 = vpop.f32.mrf.mxu0 }
  0xf7   :  { %v3129_v25 = vadd.f32 %v344_v24, %v2810_v40  ;;  %v543_v26 = vmax.f32 %v3125_v23, 0.0 }
  0xf8   :  { %v346_v27 = vpop.f32.mrf.mxu0 }
  0xf9   :  { %v3133_v28 = vadd.f32 %v346_v27, %v3031_v29  ;;  %1669 = vrot.lane.b32.xlu0 %v543_v26, %s2613_s30 }
  0xfa   :  { %v350_v30 = vpop.f32.mrf.mxu0 }
  0xfb   :  { %v3137_v31 = vadd.f32 %v350_v30, %v2810_v40  ;;  %v544_v33 = vmax.f32 %v3133_v28, 0.0 }
  0xfc   :  { %v352_v34 = vpop.f32.mrf.mxu0 }
  0xfd   :  { %v3141_v36 = vadd.f32 %v352_v34, %v3031_v29  ;;  %1671 = vrot.lane.b32.xlu1 %v544_v33, %s2613_s30 }
  0xfe   :  { %v356_v37 = vpop.f32.mrf.mxu0 }
  0xff   :  { %v3145_v39 = vadd.f32 %v356_v37, %v2810_v40  ;;  %v545_v41 = vmax.f32 %v3141_v36, 0.0 }
 0x100   :  { %v358_v43 = vpop.f32.mrf.mxu0 }
 0x101   :  { %v3149_v45 = vadd.f32 %v358_v43, %v3031_v29  ;;  %1673 = vrot.lane.b32.xlu0 %v545_v41, %s2613_s30 }
 0x102   :  { %v362_v46 = vpop.f32.mrf.mxu0 }
 0x103   :  { %v3153_v48 = vadd.f32 %v362_v46, %v2810_v40  ;;  %v546_v50 = vmax.f32 %v3149_v45, 0.0 }
 0x104   :  { %v364_v51 = vpop.f32.mrf.mxu0 }
 0x105   :  { %v3157_v53 = vadd.f32 %v364_v51, %v3031_v29  ;;  %1675 = vrot.lane.b32.xlu1 %v546_v50, %s2613_s30 }
 0x106   :  { %v368_v55 = vpop.f32.mrf.mxu0 }
 0x107   :  { %v3161_v56 = vadd.f32 %v368_v55, %v2810_v40  ;;  %v547_v58 = vmax.f32 %v3157_v53, 0.0 }
 0x108   :  { %v370_v60 = vpop.f32.mrf.mxu0 }
 0x109   :  { %v3170_v63 = vadd.f32 %v370_v60, %v3031_v29  ;;  %1677 = vrot.lane.b32.xlu0 %v547_v58, %s2613_s30 }
 0x10a   :  { %v374_v1 = vpop.f32.mrf.mxu0 }
 0x10b   :  { %v3175_v2 = vadd.f32 %v374_v1, %v2810_v40  ;;  %v548_v4 = vmax.f32 %v3170_v63, 0.0 }
 0x10c   :  { %v376_v6 = vpop.f32.mrf.mxu0 }
 0x10d   :  { %v3179_v7 = vadd.f32 %v376_v6, %v3031_v29  ;;  %1679 = vrot.lane.b32.xlu1 %v548_v4, %s2613_s30 }
 0x10e   :  { %v380_v9 = vpop.f32.mrf.mxu0 }
 0x10f   :  { %v3183_v11 = vadd.f32 %v380_v9, %v2810_v40  ;;  %v549_v12 = vmax.f32 %v3179_v7, 0.0 }
 0x110   :  { %v382_v14 = vpop.f32.mrf.mxu0 }
 0x111   :  { %v3187_v16 = vadd.f32 %v382_v14, %v3031_v29  ;;  %1681 = vrot.lane.b32.xlu0 %v549_v12, %s2613_s30 }
 0x112   :  { %v386_v17 = vpop.f32.mrf.mxu0 }
 0x113   :  { %v3191_v19 = vadd.f32 %v386_v17, %v2810_v40  ;;  %v550_v21 = vmax.f32 %v3187_v16, 0.0 }
 0x114   :  { %v388_v22 = vpop.f32.mrf.mxu0 }
 0x115   :  { %v3195_v24 = vadd.f32 %v388_v22, %v3031_v29  ;;  %1683 = vrot.lane.b32.xlu1 %v550_v21, %s2613_s30 }
 0x116   :  { %v392_v26 = vpop.f32.mrf.mxu0 }
 0x117   :  { %v3199_v27 = vadd.f32 %v392_v26, %v2810_v40  ;;  %v551_v30 = vmax.f32 %v3195_v24, 0.0 }
 0x118   :  { %v394_v33 = vpop.f32.mrf.mxu0 }
 0x119   :  { %v3203_v34 = vadd.f32 %v394_v33, %v3031_v29  ;;  %1685 = vrot.lane.b32.xlu0 %v551_v30, %s2613_s30 }
 0x11a   :  { %v398_v37 = vpop.f32.mrf.mxu0 }
 0x11b   :  { %v3207_v41 = vadd.f32 %v398_v37, %v2810_v40  ;;  %v552_v43 = vmax.f32 %v3203_v34, 0.0 }
 0x11c   :  { %v400_v46 = vpop.f32.mrf.mxu0 }
 0x11d   :  { %v3211_v50 = vadd.f32 %v400_v46, %v3031_v29  ;;  %1687 = vrot.lane.b32.xlu1 %v552_v43, %s2613_s30 }
 0x11e   :  { %v404_v51 = vpop.f32.mrf.mxu0 }
 0x11f   :  { %v3215_v55 = vadd.f32 %v404_v51, %v2810_v40  ;;  %v553_v58 = vmax.f32 %v3211_v50, 0.0 }
 0x120   :  { %v406_v60 = vpop.f32.mrf.mxu0 }
 0x121   :  { %v3219_v1 = vadd.f32 %v406_v60, %v3031_v29  ;;  %1689 = vrot.lane.b32.xlu0 %v553_v58, %s2613_s30 }
 0x122   :  { %v410_v4 = vpop.f32.mrf.mxu0 }
 0x123   :  { %v3223_v6 = vadd.f32 %v410_v4, %v2810_v40  ;;  %v554_v9 = vmax.f32 %v3219_v1, 0.0 }
 0x124   :  { %v412_v12 = vpop.f32.mrf.mxu0 }
 0x125   :  { %v3227_v14 = vadd.f32 %v412_v12, %v3031_v29  ;;  %1691 = vrot.lane.b32.xlu1 %v554_v9, %s2613_s30 }
 0x126   :  { %v416_v17 = vpop.f32.mrf.mxu0 }
 0x127   :  { %v3231_v21 = vadd.f32 %v416_v17, %v2810_v40  ;;  %v555_v22 = vmax.f32 %v3227_v14, 0.0 }
 0x128   :  { %v418_v26 = vpop.f32.mrf.mxu0 }
 0x129   :  { %v3235_v30 = vadd.f32 %v418_v26, %v3031_v29  ;;  %1693 = vrot.lane.b32.xlu0 %v555_v22, %s2613_s30 }
 0x12a   :  { %v422_v33 = vpop.f32.mrf.mxu0 }
 0x12b   :  { %v3239_v37 = vadd.f32 %v422_v33, %v2810_v40  ;;  %v556_v43 = vmax.f32 %v3235_v30, 0.0 }
 0x12c   :  { %v424_v46 = vpop.f32.mrf.mxu0 }
 0x12d   :  { %v3243_v51 = vadd.f32 %v424_v46, %v3031_v29  ;;  %1695 = vrot.lane.b32.xlu1 %v556_v43, %s2613_s30 }
 0x12e   :  { %v428_v58 = vpop.f32.mrf.mxu0 }
 0x12f   :  { %3987 = vst [vmem:[#allocation5_spill] sm:$0xff] %v3243_v51  ;;  %v3247_v60 = vadd.f32 %v428_v58, %v2810_v40  ;;  %v557_v4 = vmax.f32 %v3243_v51, 0.0 }
 0x130   :  { %v430_v9 = vpop.f32.mrf.mxu0 }
 0x131   :  { %v3251_v12 = vadd.f32 %v430_v9, %v3031_v29  ;;  %1697 = vrot.lane.b32.xlu0 %v557_v4, %s2613_s30 }
 0x132   :  { %v434_v17 = vpop.f32.mrf.mxu0 }
 0x133   :  { %3988 = vst [vmem:[#allocation6_spill] sm:$0xff] %v3251_v12  ;;  %v3255_v22 = vadd.f32 %v434_v17, %v2810_v40  ;;  %v558_v26 = vmax.f32 %v3251_v12, 0.0 }
 0x134   :  { %v436_v33 = vpop.f32.mrf.mxu0 }
 0x135   :  { %3989 = vst [vmem:[#allocation7_spill] sm:$0xff] %v3255_v22  ;;  %v3259_v43 = vadd.f32 %v436_v33, %v3031_v29  ;;  %1699 = vrot.lane.b32.xlu1 %v558_v26, %s2613_s30 }
 0x136   :  { %v440_v46 = vpop.f32.mrf.mxu0 }
 0x137   :  { %3990 = vst [vmem:[#allocation8_spill] sm:$0xff] %v3259_v43  ;;  %v3263_v58 = vadd.f32 %v440_v46, %v2810_v40  ;;  %v559_v9 = vmax.f32 %v3259_v43, 0.0 }
 0x138   :  { %v442_v51 = vpop.f32.mrf.mxu0 }
 0x139   :  { %3991 = vst [vmem:[#allocation9_spill] sm:$0xff] %v3263_v58  ;;  %v3267_v4 = vadd.f32 %v442_v51, %v3031_v29  ;;  %1701 = vrot.lane.b32.xlu0 %v559_v9, %s2613_s30 }
 0x13a   :  { %v446_v17 = vpop.f32.mrf.mxu0 }
 0x13b   :  { %3992 = vst [vmem:[#allocation10_spill] sm:$0xff] %v3267_v4  ;;  %v3271_v12 = vadd.f32 %v446_v17, %v2810_v40  ;;  %v560_v33 = vmax.f32 %v3267_v4, 0.0 }
 0x13c   :  { %v448_v22 = vpop.f32.mrf.mxu0 }
 0x13d   :  { %3993 = vst [vmem:[#allocation11_spill] sm:$0xff] %v3271_v12  ;;  %v3275_v26 = vadd.f32 %v448_v22, %v3031_v29  ;;  %1703 = vrot.lane.b32.xlu1 %v560_v33, %s2613_s30 }
 0x13e   :  { %v452_v46 = vpop.f32.mrf.mxu0 }
 0x13f   :  { %3994 = vst [vmem:[#allocation12_spill] sm:$0xff] %v3275_v26  ;;  %v3279_v43 = vadd.f32 %v452_v46, %v2810_v40  ;;  %v561_v51 = vmax.f32 %v3275_v26, 0.0 }
 0x140   :  { %v454_v58 = vpop.f32.mrf.mxu0 }
 0x141   :  { %3995 = vst [vmem:[#allocation13_spill] sm:$0xff] %v3279_v43  ;;  %v3283_v9 = vadd.f32 %v454_v58, %v3031_v29  ;;  %1705 = vrot.lane.b32.xlu0 %v561_v51, %s2613_s30 }
 0x142   :  { %v458_v17 = vpop.f32.mrf.mxu0 }
 0x143   :  { %3996 = vst [vmem:[#allocation14_spill] sm:$0xff] %v3283_v9  ;;  %v3287_v4 = vadd.f32 %v458_v17, %v2810_v40  ;;  %v562_v22 = vmax.f32 %v3283_v9, 0.0  ;;  %v469_v17 = vand.u32 2147483647, %v3037_v32  ;;  %v502_v32 = vand.u32 2147483647, %v3053_v42 }
 0x144   :  { %v460_v12 = vpop.f32.mrf.mxu0 }
 0x145   :  { %3997 = vst [vmem:[#allocation15_spill] sm:$0xff] %v3287_v4  ;;  %v3291_v33 = vadd.f32 %v460_v12, %v3031_v29  ;;  %1707 = vrot.lane.b32.xlu1 %v562_v22, %s2613_s30  ;;  %v501_v12 = vand.u32 2147483647, %v3043_v35  ;;  %v470_v4 = vand.u32 2147483647, %v3049_v38  ;;  %v1615_v38 = vld [vmem:[%s3964_s6 + $0x10] sm:$0xff] }
 0x146   :  { %v3294_v46 = vpop.f32.mrf.mxu0  ;;  %v472_v35 = vand.u32 2147483647, %v3065_v49  ;;  %v504_v49 = vand.u32 2147483647, %v3069_v52 }
 0x147   :  { %3998 = vst [vmem:[#allocation16_spill] sm:$0xff] %v3291_v33  ;;  %v563_v26 = vmax.f32 %v3291_v33, 0.0 }
 0x148   :  { %v466_v58 = vpop.f32.mrf.mxu0 }
 0x149   :  { %v3298_v43 = vadd.f32 %v466_v58, %v3031_v29  ;;  %1709 = vrot.lane.b32.xlu0 %v563_v26, %s2613_s30  ;;  %v471_v26 = vand.u32 2147483647, %v3057_v44 }
 0x14a   :  { %v2361_v51 = vpop.f32.mrf.mxu0 }
 0x14b   :  { %3999 = vst [vmem:[#allocation17_spill] sm:$0xff] %v3298_v43  ;;  %v564_v9 = vmax.f32 %v3298_v43, 0.0  ;;  %v893_v29 = vmul.f32 %v2361_v51, %v470_v4  ;;  %v503_v43 = vand.u32 2147483647, %v3061_v47  ;;  %v473_v4 = vand.u32 2147483647, %v3073_v54 }
 0x14c   :  { %v733_v22 = vpop.f32.mrf.mxu0  ;;  %v505_v51 = vand.u32 2147483647, %v3077_v57 }
 0x14d   :  { %v892_v40 = vmul.f32 %v733_v22, %v469_v17  ;;  %1711 = vrot.lane.b32.xlu1 %v564_v9, %s2613_s30  ;;  %1389 = vrot.lane.b32.xlu0 %v501_v12, %s2614_s9  ;;  %v3314_v9 = vpop.f32.mrf.mxu1  ;;  %v474_v12 = vand.u32 2147483647, %v3081_v59  ;;  %v506_v59 = vand.u32 2147483647, %v3085_v62 }
 0x14e   :  { %v2364_v58 = vpop.f32.mrf.mxu0 }
 0x14f   :  { %2439 = vmatprep.mubr.f32.mxu1 %v892_v40  ;;  %v895_v40 = vmul.f32 %v2364_v58, %v472_v35  ;;  %v3326_v35 = vpop.f32.mrf.mxu1 }
 0x150   :  { %v743_v33 = vpop.f32.mrf.mxu0  ;;  %2440 = vmatmul.mubr.f32.vlgmr.msra.gmra.mxu1 %v893_v29  ;;  %v475_v29 = vand.u32 2147483647, %v3089_v0 }
 0x151   :  { %v894_v17 = vmul.f32 %v743_v33, %v471_v26  ;;  %1391 = vrot.lane.b32.xlu1 %v502_v32, %s2614_s9  ;;  %1393 = vrot.lane.b32.xlu0 %v503_v43, %s2614_s9  ;;  %v1614_v43 = vld [vmem:[%s3964_s6 + $0x8] sm:$0xff]  ;;  %v3331_v58 = vpop.f32.mrf.mxu1  ;;  %v507_v26 = vand.u32 2147483647, %v3093_v3  ;;  %v476_v32 = vand.u32 2147483647, %v3097_v5 }
 0x152   :  { %v2367_v44 = vpop.f32.mrf.mxu0  ;;  %2488 = vmatpush3.msra.mxu1 %v3167_v61  ;;  %v508_v5 = vand.u32 2147483647, %v3101_v8 }
 0x153   :  { %2442 = vmatprep.mubr.f32.mxu1 %v894_v17  ;;  %2489 = vmatprep.subr.mxu1 %v1615_v38  ;;  %v897_v54 = vmul.f32 %v2367_v44, %v474_v12  ;;  %v478_v12 = vand.u32 2147483647, %v3113_v15  ;;  %v480_v15 = vand.u32 2147483647, %v3129_v25  ;;  %v482_v25 = vand.u32 2147483647, %v3145_v39 }
 0x154   :  { %v753_v22 = vpop.f32.mrf.mxu0  ;;  %2443 = vmatmul.mubr.f32.gmra.mxu1 %v895_v40  ;;  %v1613_v40 = vld [vmem:[%s3964_s6] sm:$0xff] }
 0x155   :  { %v896_v33 = vmul.f32 %v753_v22, %v473_v4  ;;  %1395 = vrot.lane.b32.xlu1 %v504_v49, %s2614_s9  ;;  %1397 = vrot.lane.b32.xlu0 %v505_v51, %s2614_s9  ;;  %v477_v4 = vand.u32 2147483647, %v3105_v10  ;;  %v813_v49 = vpop.f32.mrf.mxu1  ;;  %v509_v51 = vand.u32 2147483647, %v3109_v13 }
 0x156   :  { %v2370_v61 = vpop.f32.mrf.mxu0  ;;  %2490 = vmatpush3.msra.mxu1 %v1615_v38 }
 0x157   :  { %2445 = vmatprep.mubr.f32.mxu1 %v896_v33  ;;  %2491 = vmatprep.subr.mxu1 %v1614_v43  ;;  %v899_v0 = vmul.f32 %v2370_v61, %v476_v32  ;;  %v3345_v33 = vpop.f32.mrf.mxu1  ;;  %v479_v61 = vand.u32 2147483647, %v3121_v20 }
 0x158   :  { %v763_v17 = vpop.f32.mrf.mxu0  ;;  %2446 = vmatmul.mubr.f32.gmra.mxu1 %v897_v54 }
 0x159   :  { %v898_v44 = vmul.f32 %v763_v17, %v475_v29  ;;  %1399 = vrot.lane.b32.xlu1 %v506_v59, %s2614_s9  ;;  %1401 = vrot.lane.b32.xlu0 %v507_v26, %s2614_s9  ;;  %v510_v29 = vand.u32 2147483647, %v3117_v18  ;;  %v511_v59 = vand.u32 2147483647, %v3125_v23  ;;  %v823_v32 = vpop.f32.mrf.mxu1 }
 0x15a   :  { %v2373_v38 = vpop.f32.mrf.mxu0  ;;  %2492 = vmatpush3.msra.mxu1 %v1614_v43 }
 0x15b   :  { %2448 = vmatprep.mubr.f32.mxu1 %v898_v44  ;;  %2493 = vmatprep.subr.mxu1 %v1613_v40  ;;  %v901_v43 = vmul.f32 %v2373_v38, %v478_v12  ;;  %v2391_v20 = vpop.f32.mrf.mxu1  ;;  %v512_v38 = vand.u32 2147483647, %v3133_v28 }
 0x15c   :  { %v773_v22 = vpop.f32.mrf.mxu0  ;;  %2449 = vmatmul.mubr.f32.gmra.mxu1 %v899_v0 }
 0x15d   :  { %v900_v54 = vmul.f32 %v773_v22, %v477_v4  ;;  %1403 = vrot.lane.b32.xlu1 %v508_v5, %s2614_s9  ;;  %1405 = vrot.lane.b32.xlu0 %v509_v51, %s2614_s9  ;;  %v513_v4 = vand.u32 2147483647, %v3141_v36  ;;  %v483_v5 = vand.u32 2147483647, %v3153_v48  ;;  %v484_v22 = vand.u32 2147483647, %v3161_v56 }
 0x15e   :  { %v2376_v10 = vpop.f32.mrf.mxu0  ;;  %2494 = vmatpush3.msra.mxu1 %v1613_v40  ;;  %v481_v40 = vand.u32 2147483647, %v3137_v31  ;;  %v485_v48 = vand.u32 2147483647, %v3175_v2  ;;  %v486_v56 = vand.u32 2147483647, %v3183_v11 }
 0x15f   :  { %2451 = vmatprep.mubr.f32.mxu1 %v900_v54  ;;  %v903_v44 = vmul.f32 %v2376_v10, %v480_v15  ;;  %v833_v54 = vpop.f32.mrf.mxu1  ;;  %v515_v10 = vand.u32 2147483647, %v3157_v53  ;;  %v906_v39 = vmul.f32 %v3326_v35, %v483_v5  ;;  %v517_v15 = vand.u32 2147483647, %v3179_v7 }
 0x160   :  { %v783_v26 = vpop.f32.mrf.mxu0  ;;  %2452 = vmatmul.mubr.f32.gmra.mxu1 %v901_v43  ;;  %v514_v43 = vand.u32 2147483647, %v3149_v45  ;;  %v487_v35 = vand.u32 2147483647, %v3191_v19 }
 0x161   :  { %v902_v17 = vmul.f32 %v783_v26, %v479_v61  ;;  %1407 = vrot.lane.b32.xlu1 %v510_v29, %s2614_s9  ;;  %1409 = vrot.lane.b32.xlu0 %v511_v59, %s2614_s9  ;;  %v2394_v61 = vpop.f32.mrf.mxu1  ;;  %v907_v29 = vmul.f32 %v3314_v9, %v484_v22  ;;  %v516_v59 = vand.u32 2147483647, %v3170_v63  ;;  %v908_v26 = vmul.f32 %v813_v49, %v485_v48  ;;  %v4001_v48 = vld [vmem:[#allocation7_spill] sm:$0xff] }
 0x162   :  { %v2379_v0 = vpop.f32.mrf.mxu0  ;;  %v488_v9 = vand.u32 2147483647, %v3199_v27  ;;  %v489_v49 = vand.u32 2147483647, %v3207_v41  ;;  %v493_v22 = vand.u32 2147483647, %v3239_v37 }
 0x163   :  { %2454 = vmatprep.mubr.f32.mxu1 %v902_v17  ;;  %v905_v31 = vmul.f32 %v2379_v0, %v482_v25  ;;  %v843_v2 = vpop.f32.mrf.mxu1  ;;  %v909_v17 = vmul.f32 %v3331_v58, %v486_v56  ;;  %v519_v0 = vand.u32 2147483647, %v3195_v24  ;;  %v490_v58 = vand.u32 2147483647, %v3215_v55  ;;  %v4002_v56 = vld [vmem:[#allocation9_spill] sm:$0xff] }
 0x164   :  { %v793_v51 = vpop.f32.mrf.mxu0  ;;  %2455 = vmatmul.mubr.f32.gmra.mxu1 %v903_v44  ;;  %v518_v44 = vand.u32 2147483647, %v3187_v16  ;;  %v911_v19 = vmul.f32 %v3345_v33, %v488_v9  ;;  %v912_v25 = vmul.f32 %v833_v54, %v489_v49  ;;  %v492_v33 = vand.u32 2147483647, %v3231_v21  ;;  %v4007_v49 = vld [vmem:[#allocation3_spill] sm:$0xff] }
 0x165   :  { %v904_v12 = vmul.f32 %v793_v51, %v481_v40  ;;  %1411 = vrot.lane.b32.xlu1 %v512_v38, %s2614_s9  ;;  %1413 = vrot.lane.b32.xlu0 %v513_v4, %s2614_s9  ;;  %v2397_v11 = vpop.f32.mrf.mxu1  ;;  %v910_v40 = vmul.f32 %v823_v32, %v487_v35  ;;  %v520_v38 = vand.u32 2147483647, %v3203_v34  ;;  %v521_v4 = vand.u32 2147483647, %v3211_v50 }
 0x166   :  { %v491_v32 = vand.u32 2147483647, %v3223_v6  ;;  %v913_v5 = vmul.f32 %v2391_v20, %v490_v58  ;;  %v522_v55 = vand.u32 2147483647, %v3219_v1  ;;  %v523_v51 = vand.u32 2147483647, %v3227_v14 }
 0x167   :  { %2457 = vmatprep.mubr.f32.mxu1 %v904_v12  ;;  %v853_v27 = vpop.f32.mrf.mxu1  ;;  %v915_v6 = vmul.f32 %v2394_v61, %v492_v33  ;;  %v494_v54 = vand.u32 2147483647, %v3247_v60  ;;  %v524_v21 = vand.u32 2147483647, %v3235_v30  ;;  %v4003_v60 = vld [vmem:[#allocation6_spill] sm:$0xff] }
 0x168   :  { %2458 = vmatmul.mubr.f32.gmra.mxu1 %v905_v31  ;;  %v914_v12 = vmul.f32 %v843_v2, %v491_v32  ;;  %v4008_v58 = vld [vmem:[#allocation10_spill] sm:$0xff]  ;;  %v4010_v32 = vld [vmem:[#allocation15_spill] sm:$0xff] }
 0x169   :  { %1415 = vrot.lane.b32.xlu1 %v514_v43, %s2614_s9  ;;  %1417 = vrot.lane.b32.xlu0 %v515_v10, %s2614_s9  ;;  %v2400_v41 = vpop.f32.mrf.mxu1  ;;  %v4000_v43 = vld [vmem:[#allocation5_spill] sm:$0xff]  ;;  %v917_v37 = vmul.f32 %v2397_v11, %v494_v54 }
 0x16a   :  { %2460 = vmatprep.mubr.f32.mxu1 %v906_v39  ;;  %v525_v10 = vand.u32 2147483647, %v4000_v43  ;;  %v916_v39 = vmul.f32 %v853_v27, %v493_v22  ;;  %v528_v27 = vand.u32 2147483647, %v4008_v58 }
 0x16b   :  { %v863_v31 = vpop.f32.mrf.mxu1 }
 0x16c   :  { %2461 = vmatmul.mubr.f32.gmra.mxu1 %v907_v29  ;;  %v495_v29 = vand.u32 2147483647, %v4001_v48 }
 0x16d   :  { %1419 = vrot.lane.b32.xlu1 %v516_v59, %s2614_s9  ;;  %1421 = vrot.lane.b32.xlu0 %v517_v15, %s2614_s9  ;;  %v2403_v20 = vpop.f32.mrf.mxu1  ;;  %v496_v59 = vand.u32 2147483647, %v4002_v56  ;;  %v526_v15 = vand.u32 2147483647, %v4003_v60 }
 0x16e   :  { %2463 = vmatprep.mubr.f32.mxu1 %v908_v26  ;;  %v4004_v26 = vld [vmem:[#allocation8_spill] sm:$0xff]  ;;  %v918_v2 = vmul.f32 %v863_v31, %v495_v29 }
 0x16f   :  { %v873_v61 = vpop.f32.mrf.mxu1  ;;  %v527_v35 = vand.u32 2147483647, %v4004_v26 }
 0x170   :  { %2464 = vmatmul.mubr.f32.gmra.mxu1 %v909_v17  ;;  %v4005_v17 = vld [vmem:[#allocation11_spill] sm:$0xff] }
 0x171   :  { %1423 = vrot.lane.b32.xlu1 %v518_v44, %s2614_s9  ;;  %1425 = vrot.lane.b32.xlu0 %v519_v0, %s2614_s9  ;;  %v497_v9 = vand.u32 2147483647, %v4005_v17  ;;  %v2406_v44 = vpop.f32.mrf.mxu1  ;;  %v919_v0 = vmul.f32 %v2400_v41, %v496_v59 }
 0x172   :  { %2466 = vmatprep.mubr.f32.mxu1 %v910_v40  ;;  %v4006_v40 = vld [vmem:[#allocation13_spill] sm:$0xff] }
 0x173   :  { %v498_v11 = vand.u32 2147483647, %v4006_v40  ;;  %v883_v33 = vpop.f32.mrf.mxu1 }
 0x174   :  { %2467 = vmatmul.mubr.f32.gmra.mxu1 %v911_v19  ;;  %v465_v19 = vadd.f32 %v3294_v46, %v4007_v49  ;;  %v4012_v46 = vld [vmem:[#allocation16_spill] sm:$0xff] }
 0x175   :  { %1427 = vrot.lane.b32.xlu1 %v520_v38, %s2614_s9  ;;  %1429 = vrot.lane.b32.xlu0 %v521_v4, %s2614_s9  ;;  %v4009_v38 = vld [vmem:[#allocation12_spill] sm:$0xff]  ;;  %v921_v41 = vmul.f32 %v2403_v20, %v498_v11  ;;  %v531_v22 = vand.u32 2147483647, %v4012_v46 }
 0x176   :  { %2469 = vmatprep.mubr.f32.mxu1 %v912_v25  ;;  %v529_v4 = vand.u32 2147483647, %v4009_v38  ;;  %v920_v25 = vmul.f32 %v873_v61, %v497_v9 }
 0x178   :  { %2470 = vmatmul.mubr.f32.gmra.mxu1 %v913_v5  ;;  %v499_v5 = vand.u32 2147483647, %v4010_v32 }
 0x179   :  { %1431 = vrot.lane.b32.xlu1 %v522_v55, %s2614_s9  ;;  %1433 = vrot.lane.b32.xlu0 %v523_v51, %s2614_s9  ;;  %v500_v55 = vand.u32 2147483647, %v465_v19  ;;  %v4011_v51 = vld [vmem:[#allocation14_spill] sm:$0xff] }
 0x17a   :  { %2472 = vmatprep.mubr.f32.mxu1 %v914_v12  ;;  %v530_v12 = vand.u32 2147483647, %v4011_v51  ;;  %v922_v31 = vmul.f32 %v883_v33, %v499_v5 }
 0x17b   :  { %v923_v54 = vmul.f32 %v2406_v44, %v500_v55 }
 0x17c   :  { %2473 = vmatmul.mubr.f32.gmra.mxu1 %v915_v6  ;;  %v1650_v6 = vpop.permute.xlu0 %1649 }
 0x17d   :  { %1435 = vrot.lane.b32.xlu1 %v524_v21, %s2614_s9  ;;  %1437 = vrot.lane.b32.xlu0 %v525_v10, %s2614_s9  ;;  %v4013_v21 = vld [vmem:[#allocation17_spill] sm:$0xff] }
 0x17e   :  { %2475 = vmatprep.mubr.f32.mxu1 %v916_v39  ;;  %v532_v10 = vand.u32 2147483647, %v4013_v21  ;;  %v1654_v39 = vpop.permute.xlu1 %1653 }
 0x180   :  { %2476 = vmatmul.mubr.f32.gmra.mxu1 %v917_v37  ;;  %v1652_v20 = vpop.permute.xlu0 %1651 }
 0x181   :  { %1439 = vrot.lane.b32.xlu1 %v526_v15, %s2614_s9  ;;  %1441 = vrot.lane.b32.xlu0 %v527_v35, %s2614_s9 }
 0x182   :  { %2478 = vmatprep.mubr.f32.mxu1 %v918_v2  ;;  %v1656_v48 = vpop.permute.xlu1 %1655 }
 0x184   :  { %2479 = vmatmul.mubr.f32.gmra.mxu1 %v919_v0  ;;  %v1658_v29 = vpop.permute.xlu0 %1657 }
 0x185   :  { %1443 = vrot.lane.b32.xlu1 %v528_v27, %s2614_s9  ;;  %1445 = vrot.lane.b32.xlu0 %v529_v4, %s2614_s9 }
 0x186   :  { %2481 = vmatprep.mubr.f32.mxu1 %v920_v25  ;;  %v1660_v37 = vpop.permute.xlu1 %1659 }
 0x188   :  { %2482 = vmatmul.mubr.f32.gmra.mxu1 %v921_v41  ;;  %v1662_v56 = vpop.permute.xlu0 %1661 }
 0x189   :  { %1447 = vrot.lane.b32.xlu1 %v530_v12, %s2614_s9  ;;  %1449 = vrot.lane.b32.xlu0 %v531_v22, %s2614_s9 }
 0x18a   :  { %2484 = vmatprep.mubr.f32.mxu1 %v922_v31  ;;  %v1664_v59 = vpop.permute.xlu1 %1663 }
 0x18c   :  { %2485 = vmatmul.mubr.f32.gmra.mxu1 %v923_v54  ;;  %v1666_v61 = vpop.permute.xlu0 %1665  ;;  %v13_v54 = vstv %s3965_s7 }
 0x18d   :  { %1451 = vrot.lane.b32.xlu1 %v532_v10, %s2614_s9  ;;  %2495 = vmatprep.mubr.msk.f32.mxu1 %vm115_vm1, %v1650_v6  ;;  %14 = vst [vmem:[#allocation2] sm:$0x1] %v13_v54 }
 0x18e   :  { %v1668_v15 = vpop.permute.xlu1 %1667 }
 0x190   :  { %2496 = vmatmul.mubr.msk.f32.vlgmr.msra.gmra.mxu1 %vm115_vm1, %v1652_v20  ;;  %v1670_v35 = vpop.permute.xlu0 %1669 }
 0x191   :  { %2498 = vmatprep.mubr.msk.f32.mxu1 %vm115_vm1, %v1654_v39 }
 0x192   :  { %v1672_v2 = vpop.permute.xlu1 %1671 }
 0x194   :  { %2499 = vmatmul.mubr.msk.f32.gmra.mxu1 %vm115_vm1, %v1656_v48  ;;  %v1674_v17 = vpop.permute.xlu0 %1673 }
 0x195   :  { %2501 = vmatprep.mubr.msk.f32.mxu1 %vm115_vm1, %v1658_v29 }
 0x196   :  { %v1676_v9 = vpop.permute.xlu1 %1675 }
 0x198   :  { %2502 = vmatmul.mubr.msk.f32.gmra.mxu1 %vm115_vm1, %v1660_v37  ;;  %v1678_v44 = vpop.permute.xlu0 %1677  ;;  %v4014_v37 = vld [vmem:[#allocation4_spill] sm:$0xff] }
 0x199   :  { %2504 = vmatprep.mubr.msk.f32.mxu1 %vm115_vm1, %v1662_v56 }
 0x19a   :  { %v1680_v0 = vpop.permute.xlu1 %1679 }
 0x19c   :  { %2505 = vmatmul.mubr.msk.f32.gmra.mxu1 %vm115_vm1, %v1664_v59  ;;  %v1682_v40 = vpop.permute.xlu0 %1681 }
 0x19d   :  { %2507 = vmatprep.mubr.msk.f32.mxu1 %vm115_vm1, %v1666_v61 }
 0x19e   :  { %v1684_v11 = vpop.permute.xlu1 %1683 }
 0x1a0   :  { %2508 = vmatmul.mubr.msk.f32.gmra.mxu1 %vm115_vm1, %v1668_v15  ;;  %v1686_v49 = vpop.permute.xlu0 %1685 }
 0x1a1   :  { %2510 = vmatprep.mubr.msk.f32.mxu1 %vm115_vm1, %v1670_v35 }
 0x1a2   :  { %v1688_v19 = vpop.permute.xlu1 %1687 }
 0x1a4   :  { %2511 = vmatmul.mubr.msk.f32.gmra.mxu1 %vm115_vm1, %v1672_v2  ;;  %v1690_v27 = vpop.permute.xlu0 %1689 }
 0x1a5   :  { %2513 = vmatprep.mubr.msk.f32.mxu1 %vm115_vm1, %v1674_v17 }
 0x1a6   :  { %v1692_v4 = vpop.permute.xlu1 %1691 }
 0x1a8   :  { %2514 = vmatmul.mubr.msk.f32.gmra.mxu1 %vm115_vm1, %v1676_v9  ;;  %v1694_v25 = vpop.permute.xlu0 %1693 }
 0x1a9   :  { %2516 = vmatprep.mubr.msk.f32.mxu1 %vm115_vm1, %v1678_v44 }
 0x1aa   :  { %v1696_v32 = vpop.permute.xlu1 %1695 }
 0x1ac   :  { %2517 = vmatmul.mubr.msk.f32.gmra.mxu1 %vm115_vm1, %v1680_v0  ;;  %v1698_v5 = vpop.permute.xlu0 %1697 }
 0x1ad   :  { %2519 = vmatprep.mubr.msk.f32.mxu1 %vm115_vm1, %v1682_v40 }
 0x1ae   :  { %v1700_v33 = vpop.permute.xlu1 %1699 }
 0x1b0   :  { %2520 = vmatmul.mubr.msk.f32.gmra.mxu1 %vm115_vm1, %v1684_v11  ;;  %v1702_v41 = vpop.permute.xlu0 %1701 }
 0x1b1   :  { %2522 = vmatprep.mubr.msk.f32.mxu1 %vm115_vm1, %v1686_v49 }
 0x1b2   :  { %v1704_v55 = vpop.permute.xlu1 %1703 }
 0x1b4   :  { %2523 = vmatmul.mubr.msk.f32.gmra.mxu1 %vm115_vm1, %v1688_v19  ;;  %v1706_v12 = vpop.permute.xlu0 %1705 }
 0x1b5   :  { %2525 = vmatprep.mubr.msk.f32.mxu1 %vm115_vm1, %v1690_v27 }
 0x1b7   :  { %v1708_v22 = vpop.permute.xlu1 %1707 }
 0x1b8   :  { %2526 = vmatmul.mubr.msk.f32.gmra.mxu1 %vm115_vm1, %v1692_v4 }
 0x1b9   :  { %2528 = vmatprep.mubr.msk.f32.mxu1 %vm115_vm1, %v1694_v25 }
 0x1bb   :  { %v1710_v31 = vpop.permute.xlu0 %1709 }
 0x1bc   :  { %2529 = vmatmul.mubr.msk.f32.gmra.mxu1 %vm115_vm1, %v1696_v32 }
 0x1bd   :  { %2531 = vmatprep.mubr.msk.f32.mxu1 %vm115_vm1, %v1698_v5 }
 0x1bf   :  { %v1712_v6 = vpop.permute.xlu1 %1711  ;;  %v3457_v10 = vpop.permute.xlu0 %1389 }
 0x1c0   :  { %2532 = vmatmul.mubr.msk.f32.gmra.mxu1 %vm115_vm1, %v1700_v33 }
 0x1c1   :  { %2534 = vmatprep.mubr.msk.f32.mxu1 %vm115_vm1, %v1702_v41 }
 0x1c3   :  { %v3466_v59 = vpop.permute.xlu1 %1391  ;;  %v3472_v17 = vpop.permute.xlu0 %1393 }
 0x1c4   :  { %2535 = vmatmul.mubr.msk.f32.gmra.mxu1 %vm115_vm1, %v1704_v55 }
 0x1c5   :  { %2537 = vmatprep.mubr.msk.f32.mxu1 %vm115_vm1, %v1706_v12 }
 0x1c7   :  { %v3481_v19 = vpop.permute.xlu1 %1395  ;;  %v3488_v32 = vpop.permute.xlu0 %1397 }
 0x1c8   :  { %2538 = vmatmul.mubr.msk.f32.gmra.mxu1 %vm115_vm1, %v1708_v22 }
 0x1c9   :  { %2540 = vmatprep.mubr.msk.f32.mxu1 %vm115_vm1, %v1710_v31 }
 0x1cb   :  { %v3494_v22 = vpop.permute.xlu1 %1399 }
 0x1cc   :  { %2541 = vmatmul.mubr.msk.f32.gmra.mxu1 %vm115_vm1, %v1712_v6 }
 0x210   :  { %v2441_v39 = vpop.f32.mrf.mxu1 }
 0x211   :  { %v3460_v20 = vadd.f32 %v2441_v39, %v3053_v42  ;;  %v3503_v39 = vpop.permute.xlu0 %1401 }
 0x212   :  { %v1006_v48 = vpop.f32.mrf.mxu1 }
 0x213   :  { %v1198_v29 = vmin.f32 %v3460_v20, 0.0  ;;  %v3464_v56 = vadd.f32 %v1006_v48, %v4014_v37  ;;  %vm1166_vm3 = vcmp.gt.f32.partialorder %v3460_v20, 0.0 }
 0x214   :  { %v2444_v61 = vpop.f32.mrf.mxu1 }
 0x215   :  { %v1231_v15 = vmul.f32 1.442695, %v1198_v29  ;;  %v1197_v35 = vmin.f32 %v3464_v56, 0.0  ;;  %v3470_v2 = vadd.f32 %v2444_v61, %v3069_v52  ;;  %vm1165_vm4 = vcmp.gt.f32.partialorder %v3464_v56, 0.0 }
 0x216   :  { %v1016_v9 = vpop.f32.mrf.mxu1 }
 0x217   :  { %2548 = vpow2.f32 %v1231_v15  ;;  %v1229_v42 = vmul.f32 1.442695, %v1197_v35  ;;  %v1200_v44 = vmin.f32 %v3470_v2, 0.0  ;;  %v3476_v0 = vadd.f32 %v1016_v9, %v3061_v47 }
 0x218   :  { %v2447_v40 = vpop.f32.mrf.mxu1  ;;  %vm1168_vm5 = vcmp.gt.f32.partialorder %v3470_v2, 0.0 }
 0x219   :  { %2550 = vpow2.f32 %v1229_v42  ;;  %v1235_v11 = vmul.f32 1.442695, %v1200_v44  ;;  %v3479_v49 = vadd.f32 %v2447_v40, %v3085_v62  ;;  %v1199_v52 = vmin.f32 %v3476_v0, 0.0  ;;  %v3514_v44 = vpop.permute.xlu1 %1403 }
 0x21a   :  { %v1026_v27 = vpop.f32.mrf.mxu1  ;;  %vm1167_vm6 = vcmp.gt.f32.partialorder %v3476_v0, 0.0 }
 0x21b   :  { %2552 = vpow2.f32 %v1235_v11  ;;  %v1202_v4 = vmin.f32 %v3479_v49, 0.0  ;;  %v3486_v25 = vadd.f32 %v1026_v27, %v3077_v57  ;;  %v1233_v47 = vmul.f32 1.442695, %v1199_v52  ;;  %v3518_v27 = vpop.permute.xlu0 %1405 }
 0x21c   :  { %v2450_v5 = vpop.f32.mrf.mxu1  ;;  %vm1170_vm7 = vcmp.gt.f32.partialorder %v3479_v49, 0.0 }
 0x21d   :  { %v1201_v33 = vmin.f32 %v3486_v25, 0.0  ;;  %v3492_v62 = vadd.f32 %v2450_v5, %v3101_v8  ;;  %2554 = vpow2.f32 %v1233_v47  ;;  %v1239_v41 = vmul.f32 1.442695, %v1202_v4 }
 0x21e   :  { %v1036_v55 = vpop.f32.mrf.mxu1  ;;  %vm1169_vm8 = vcmp.gt.f32.partialorder %v3486_v25, 0.0 }
 0x21f   :  { %v1237_v12 = vmul.f32 1.442695, %v1201_v33  ;;  %v1204_v31 = vmin.f32 %v3492_v62, 0.0  ;;  %v3498_v57 = vadd.f32 %v1036_v55, %v3093_v3  ;;  %vm1172_vm9 = vcmp.gt.f32.partialorder %v3492_v62, 0.0 }
 0x220   :  { %v2453_v6 = vpop.f32.mrf.mxu1 }
 0x221   :  { %2556 = vpow2.f32 %v1237_v12  ;;  %v3501_v54 = vadd.f32 %v2453_v6, %v3117_v18  ;;  %v1203_v8 = vmin.f32 %v3498_v57, 0.0  ;;  %v1243_v61 = vmul.f32 1.442695, %v1204_v31 }
 0x222   :  { %2558 = vpow2.f32 %v1239_v41  ;;  %v1046_v48 = vpop.f32.mrf.mxu1  ;;  %vm1171_vm10 = vcmp.gt.f32.partialorder %v3498_v57, 0.0 }
 0x223   :  { %v3507_v29 = vadd.f32 %v1046_v48, %v3109_v13  ;;  %v1241_v15 = vmul.f32 1.442695, %v1203_v8  ;;  %v1206_v3 = vmin.f32 %v3501_v54, 0.0  ;;  %vm1174_vm12 = vcmp.gt.f32.partialorder %v3501_v54, 0.0 }
 0x224   :  { %v2549_v37 = vpop.eup %2548  ;;  %v2456_v35 = vpop.f32.mrf.mxu1 }
 0x225   :  { %v1205_v9 = vmin.f32 %v3507_v29, 0.0  ;;  %v3512_v18 = vadd.f32 %v2456_v35, %v3133_v28  ;;  %2560 = vpow2.f32 %v1241_v15  ;;  %v2176_v11 = vadd.f32 -1.0, %v2549_v37 }
 0x226   :  { %v2551_v42 = vpop.eup %2550  ;;  %v1056_v40 = vpop.f32.mrf.mxu1  ;;  %2562 = vpow2.f32 %v1243_v61  ;;  %v1247_v33 = vmul.f32 1.442695, %v1206_v3  ;;  %vm1173_vm11 = vcmp.gt.f32.partialorder %v3507_v29, 0.0 }
 0x227   :  { %v1245_v13 = vmul.f32 1.442695, %v1205_v9  ;;  %v3521_v4 = vadd.f32 %v1056_v40, %v3125_v23  ;;  %v1326_v47 = vsel %vm1166_vm3, %v3460_v20, %v2176_v11  ;;  %v2175_v5 = vadd.f32 -1.0, %v2551_v42  ;;  %v3548_v40 = vpop.permute.xlu0 %1409 }
 0x228   :  { %v2553_v52 = vpop.eup %2552  ;;  %v2459_v28 = vpop.f32.mrf.mxu1  ;;  %v1208_v41 = vmin.f32 %v3512_v18, 0.0  ;;  %v1486_v12 = vmul.f32 %v3466_v59, %v1326_v47  ;;  %vm1176_vm14 = vcmp.gt.f32.partialorder %v3512_v18, 0.0 }
 0x229   :  { %v3526_v55 = vadd.f32 %v2459_v28, %v3149_v45  ;;  %2564 = vpow2.f32 %v1245_v13  ;;  %v1207_v31 = vmin.f32 %v3521_v4, 0.0  ;;  %v1325_v23 = vsel %vm1165_vm4, %v3464_v56, %v2175_v5  ;;  %v3539_v59 = vpop.permute.xlu1 %1407 }
 0x22a   :  { %v1066_v6 = vpop.f32.mrf.mxu1  ;;  %v2178_v8 = vadd.f32 -1.0, %v2553_v52  ;;  %v2555_v48 = vpop.eup %2554  ;;  %v1520_v61 = vsel %vm115_vm1, %v1486_v12, 0.0  ;;  %v1485_v35 = vmul.f32 %v3457_v10, %v1325_v23  ;;  %2566 = vpow2.f32 %v1247_v33 }
 0x22b   :  { %v1210_v20 = vmin.f32 %v3526_v55, 0.0  ;;  %v3537_v45 = vadd.f32 %v1066_v6, %v3141_v36  ;;  %v1249_v37 = vmul.f32 1.442695, %v1207_v31  ;;  %v1251_v3 = vmul.f32 1.442695, %v1208_v41  ;;  %1521 = vadd.xlane.f32.xlu1 %v1520_v61 }
 0x22c   :  { %v2462_v15 = vpop.f32.mrf.mxu1  ;;  %v1328_v56 = vsel %vm1168_vm5, %v3470_v2, %v2178_v8  ;;  %v1517_v11 = vsel %vm115_vm1, %v1485_v35, 0.0  ;;  %v2177_v52 = vadd.f32 -1.0, %v2555_v48  ;;  %vm1175_vm13 = vcmp.gt.f32.partialorder %v3521_v4, 0.0 }
 0x22d   :  { %v1209_v9 = vmin.f32 %v3537_v45, 0.0  ;;  %v3546_v42 = vadd.f32 %v2462_v15, %v3170_v63  ;;  %v1488_v10 = vmul.f32 %v3481_v19, %v1328_v56  ;;  %2568 = vpow2.f32 %v1249_v37  ;;  %1518 = vadd.xlane.f32.xlu0 %v1517_v11  ;;  %v3565_v23 = vpop.permute.xlu1 %1411  ;;  %v3577_v15 = vpop.permute.xlu0 %1413 }
 0x22e   :  { %v2557_v36 = vpop.eup %2556  ;;  %v1076_v13 = vpop.f32.mrf.mxu1  ;;  %v1255_v28 = vmul.f32 1.442695, %v1210_v20  ;;  %v1327_v41 = vsel %vm1167_vm6, %v3476_v0, %v2177_v52  ;;  %2570 = vpow2.f32 %v1251_v3  ;;  %vm1178_vm15 = vcmp.gt.f32.partialorder %v3526_v55, 0.0 }
 0x22f   :  { %v2559_v2 = vpop.eup %2558  ;;  %v1212_v47 = vmin.f32 %v3546_v42, 0.0  ;;  %v1253_v63 = vmul.f32 1.442695, %v1209_v9  ;;  %v3556_v5 = vadd.f32 %v1076_v13, %v3157_v53  ;;  %v2179_v12 = vadd.f32 -1.0, %v2557_v36 }
 0x230   :  { %v2465_v33 = vpop.f32.mrf.mxu1  ;;  %v1526_v6 = vsel %vm115_vm1, %v1488_v10, 0.0  ;;  %v1487_v53 = vmul.f32 %v3472_v17, %v1327_v41  ;;  %v2180_v0 = vadd.f32 -1.0, %v2559_v2  ;;  %2572 = vpow2.f32 %v1255_v28 }
 0x231   :  { %v1259_v19 = vmul.f32 1.442695, %v1212_v47  ;;  %v3562_v31 = vadd.f32 %v2465_v33, %v3187_v16  ;;  %v1211_v8 = vmin.f32 %v3556_v5, 0.0  ;;  %v1329_v20 = vsel %vm1169_vm8, %v3486_v25, %v2179_v12  ;;  %1527 = vadd.xlane.f32.xlu0 %v1526_v6  ;;  %v3592_v47 = vpop.permute.xlu1 %1415 }
 0x232   :  { %v1086_v48 = vpop.f32.mrf.mxu1  ;;  %v2561_v37 = vpop.eup %2560  ;;  %2574 = vpow2.f32 %v1253_v63  ;;  %v1489_v56 = vmul.f32 %v3488_v32, %v1329_v20  ;;  %v1330_v25 = vsel %vm1170_vm7, %v3479_v49, %v2180_v0  ;;  %vm1177_vm0 = vcmp.gt.f32.partialorder %v3537_v45, 0.0 }
 0x233   :  { %v1214_v16 = vmin.f32 %v3562_v31, 0.0  ;;  %v3575_v61 = vadd.f32 %v1086_v48, %v3179_v7  ;;  %v1257_v35 = vmul.f32 1.442695, %v1211_v8  ;;  %v2563_v3 = vpop.eup %2562  ;;  %2576 = vpow2.f32 %v1259_v19  ;;  %v3603_v48 = vpop.permute.xlu0 %1417 }
 0x234   :  { %v2468_v17 = vpop.f32.mrf.mxu1  ;;  %v1523_v7 = vsel %vm115_vm1, %v1487_v53, 0.0  ;;  %v1529_v13 = vsel %vm115_vm1, %v1489_v56, 0.0  ;;  %v1490_v52 = vmul.f32 %v3494_v22, %v1330_v25  ;;  %v2181_v32 = vadd.f32 -1.0, %v2561_v37 }
 0x235   :  { %v1263_v9 = vmul.f32 1.442695, %v1214_v16  ;;  %v1213_v36 = vmin.f32 %v3575_v61, 0.0  ;;  %v3585_v11 = vadd.f32 %v2468_v17, %v3203_v34  ;;  %2578 = vpow2.f32 %v1257_v35  ;;  %1524 = vadd.xlane.f32.xlu0 %v1523_v7  ;;  %1530 = vadd.xlane.f32.xlu1 %v1529_v13  ;;  %v3621_v7 = vpop.permute.xlu1 %1419 }
 0x236   :  { %v1096_v10 = vpop.f32.mrf.mxu1  ;;  %v2565_v2 = vpop.eup %2564  ;;  %v1331_v33 = vsel %vm1171_vm10, %v3498_v57, %v2181_v32  ;;  %v2182_v22 = vadd.f32 -1.0, %v2563_v3  ;;  %v1532_v19 = vsel %vm115_vm1, %v1490_v52, 0.0  ;;  %vm1180_vm2 = vcmp.gt.f32.partialorder %v3546_v42, 0.0 }
 0x237   :  { %v1261_v49 = vmul.f32 1.442695, %v1213_v36  ;;  %v1216_v28 = vmin.f32 %v3585_v11, 0.0  ;;  %2580 = vpow2.f32 %v1263_v9  ;;  %v3595_v34 = vadd.f32 %v1096_v10, %v3195_v24  ;;  %v2567_v8 = vpop.eup %2566  ;;  %v3629_v10 = vpop.permute.xlu0 %1421 }
 0x238   :  { %v2471_v63 = vpop.f32.mrf.mxu1  ;;  %v1491_v6 = vmul.f32 %v3503_v39, %v1331_v33  ;;  %v1332_v57 = vsel %vm1172_vm9, %v3492_v62, %v2182_v22  ;;  %v2183_v20 = vadd.f32 -1.0, %v2565_v2  ;;  %v2184_v9 = vadd.f32 -1.0, %v2567_v8 }
 0x239   :  { %v1267_v41 = vmul.f32 1.442695, %v1216_v28  ;;  %v3599_v12 = vadd.f32 %v2471_v63, %v3219_v1  ;;  %2582 = vpow2.f32 %v1261_v49  ;;  %v1215_v53 = vmin.f32 %v3595_v34, 0.0  ;;  %1533 = vadd.xlane.f32.xlu0 %v1532_v19 }
 0x23a   :  { %v1106_v24 = vpop.f32.mrf.mxu1  ;;  %v1535_v39 = vsel %vm115_vm1, %v1491_v6, 0.0  ;;  %v2569_v0 = vpop.eup %2568  ;;  %v1492_v17 = vmul.f32 %v3514_v44, %v1332_v57  ;;  %v1333_v62 = vsel %vm1173_vm11, %v3507_v29, %v2183_v20  ;;  %v1334_v49 = vsel %vm1174_vm12, %v3501_v54, %v2184_v9 }
 0x23b   :  { %2584 = vpow2.f32 %v1267_v41  ;;  %v1218_v1 = vmin.f32 %v3599_v12, 0.0  ;;  %v1265_v37 = vmul.f32 1.442695, %v1215_v53  ;;  %1536 = vadd.xlane.f32.xlu1 %v1535_v39  ;;  %v3613_v16 = vadd.f32 %v1106_v24, %v3211_v50  ;;  %v2571_v36 = vpop.eup %2570  ;;  %v3651_v24 = vpop.permute.xlu1 %1423 }
 0x23c   :  { %v2474_v35 = vpop.f32.mrf.mxu1  ;;  %v1493_v3 = vmul.f32 %v3518_v27, %v1333_v62  ;;  %v1538_v13 = vsel %vm115_vm1, %v1492_v17, 0.0  ;;  %v2185_v28 = vadd.f32 -1.0, %v2569_v0  ;;  %v1494_v41 = vmul.f32 %v3539_v59, %v1334_v49 }
 0x23d   :  { %v1271_v56 = vmul.f32 1.442695, %v1218_v1  ;;  %v3618_v25 = vadd.f32 %v2474_v35, %v3235_v30  ;;  %2586 = vpow2.f32 %v1265_v37  ;;  %v1217_v50 = vmin.f32 %v3613_v16, 0.0  ;;  %1539 = vadd.xlane.f32.xlu0 %v1538_v13  ;;  %v2573_v27 = vpop.eup %2572 }
 0x23e   :  { %v1116_v44 = vpop.f32.mrf.mxu1  ;;  %v1541_v29 = vsel %vm115_vm1, %v1493_v3, 0.0  ;;  %v2186_v19 = vadd.f32 -1.0, %v2571_v36  ;;  %v1335_v54 = vsel %vm1175_vm13, %v3521_v4, %v2185_v28  ;;  %v1544_v59 = vsel %vm115_vm1, %v1494_v41, 0.0 }
 0x23f   :  { %2588 = vpow2.f32 %v1271_v56  ;;  %v1220_v30 = vmin.f32 %v3618_v25, 0.0  ;;  %v1269_v52 = vmul.f32 1.442695, %v1217_v50  ;;  %1542 = vadd.xlane.f32.xlu1 %v1541_v29  ;;  %v3632_v32 = vadd.f32 %v1116_v44, %v3227_v14  ;;  %v2575_v63 = vpop.eup %2574  ;;  %v3666_v56 = vpop.permute.xlu0 %1425 }
 0x240   :  { %v2477_v2 = vpop.f32.mrf.mxu1  ;;  %v3641_v6 = vpop.eup %2576  ;;  %v1495_v20 = vmul.f32 %v3548_v40, %v1335_v54  ;;  %v1336_v4 = vsel %vm1176_vm14, %v3512_v18, %v2186_v19  ;;  %v2187_v62 = vadd.f32 -1.0, %v2575_v63  ;;  %vm1179_vm3 = vcmp.gt.f32.partialorder %v3556_v5, 0.0 }
 0x241   :  { %v1275_v33 = vmul.f32 1.442695, %v1220_v30  ;;  %v3638_v22 = vadd.f32 %v2477_v2, %v4003_v60  ;;  %2590 = vpow2.f32 %v1269_v52  ;;  %v1219_v14 = vmin.f32 %v3632_v32, 0.0  ;;  %1545 = vadd.xlane.f32.xlu0 %v1544_v59  ;;  %v3685_v28 = vpop.permute.xlu1 %1427 }
 0x242   :  { %v1126_v8 = vpop.f32.mrf.mxu1  ;;  %v2579_v53 = vpop.eup %2578  ;;  %v1496_v17 = vmul.f32 %v3565_v23, %v1336_v4  ;;  %v1337_v50 = vsel %vm1177_vm0, %v3537_v45, %v2187_v62  ;;  %v2188_v30 = vadd.f32 -1.0, %v2573_v27  ;;  %vm1182_vm4 = vcmp.gt.f32.partialorder %v3562_v31, 0.0 }
 0x243   :  { %2592 = vpow2.f32 %v1275_v33  ;;  %v1222_v60 = vmin.f32 %v3638_v22, 0.0  ;;  %v1273_v57 = vmul.f32 1.442695, %v1219_v14  ;;  %v3655_v1 = vadd.f32 %v1126_v8, %v4000_v43  ;;  %v3695_v41 = vpop.permute.xlu0 %1429 }
 0x244   :  { %v2480_v39 = vpop.f32.mrf.mxu1  ;;  %v3660_v0 = vpop.eup %2580  ;;  %v1547_v43 = vsel %vm115_vm1, %v1495_v20, 0.0  ;;  %v1550_v23 = vsel %vm115_vm1, %v1496_v17, 0.0  ;;  %v1497_v52 = vmul.f32 %v3577_v15, %v1337_v50  ;;  %v2189_v49 = vadd.f32 -1.0, %v2579_v53 }
 0x245   :  { %v1279_v37 = vmul.f32 1.442695, %v1222_v60  ;;  %v3663_v35 = vadd.f32 %v2480_v39, %v4008_v58  ;;  %2594 = vpow2.f32 %v1273_v57  ;;  %v1221_v40 = vmin.f32 %v3655_v1, 0.0  ;;  %1548 = vadd.xlane.f32.xlu1 %v1547_v43  ;;  %1551 = vadd.xlane.f32.xlu0 %v1550_v23  ;;  %v1432_v4 = vpop.permute.xlu1 %1431 }
 0x246   :  { %v1136_v3 = vpop.f32.mrf.mxu1  ;;  %v2583_v18 = vpop.eup %2582  ;;  %vm1181_vm5 = vcmp.gt.f32.partialorder %v3575_v61, 0.0  ;;  %vm1184_vm6 = vcmp.gt.f32.partialorder %v3585_v11, 0.0  ;;  %v2190_v57 = vadd.f32 -1.0, %v3641_v6  ;;  %vm1183_vm7 = vcmp.gt.f32.partialorder %v3595_v34, 0.0 }
 0x247   :  { %2596 = vpow2.f32 %v1279_v37  ;;  %v1224_v58 = vmin.f32 %v3663_v35, 0.0  ;;  %v1277_v36 = vmul.f32 1.442695, %v1221_v40  ;;  %v3679_v13 = vadd.f32 %v1136_v3, %v4004_v26  ;;  %v1434_v23 = vpop.permute.xlu0 %1433 }
 0x248   :  { %v3675_v9 = vpop.eup %2584  ;;  %v2483_v44 = vpop.f32.mrf.mxu1  ;;  %v1338_v26 = vsel %vm1178_vm15, %v3526_v55, %v2188_v30  ;;  %v1339_v55 = vsel %vm1179_vm3, %v3556_v5, %v2189_v49  ;;  %vm1186_vm8 = vcmp.gt.f32.partialorder %v3599_v12, 0.0  ;;  %v1340_v37 = vsel %vm1180_vm2, %v3546_v42, %v2190_v57 }
 0x249   :  { %v1283_v29 = vmul.f32 1.442695, %v1224_v58  ;;  %v3683_v2 = vadd.f32 %v2483_v44, %v4011_v51  ;;  %2598 = vpow2.f32 %v1277_v36  ;;  %v1223_v63 = vmin.f32 %v3679_v13, 0.0 }
 0x24a   :  { %v1146_v45 = vpop.f32.mrf.mxu1  ;;  %v2587_v27 = vpop.eup %2586  ;;  %v1553_v51 = vsel %vm115_vm1, %v1497_v52, 0.0  ;;  %v1498_v14 = vmul.f32 %v3592_v47, %v1338_v26  ;;  %v1499_v59 = vmul.f32 %v3603_v48, %v1339_v55  ;;  %v2191_v17 = vadd.f32 -1.0, %v2583_v18 }
 0x24b   :  { %2600 = vpow2.f32 %v1283_v29  ;;  %v1226_v15 = vmin.f32 %v3683_v2, 0.0  ;;  %1554 = vadd.xlane.f32.xlu1 %v1553_v51  ;;  %v1281_v19 = vmul.f32 1.442695, %v1223_v63  ;;  %v3702_v54 = vadd.f32 %v1146_v45, %v4009_v38  ;;  %v1436_v26 = vpop.permute.xlu1 %1435 }
 0x24c   :  { %v2589_v33 = vpop.eup %2588  ;;  %v2486_v8 = vpop.f32.mrf.mxu1  ;;  %v1556_v47 = vsel %vm115_vm1, %v1498_v14, 0.0  ;;  %v1559_v48 = vsel %vm115_vm1, %v1499_v59, 0.0  ;;  %v1500_v40 = vmul.f32 %v3621_v7, %v1340_v37  ;;  %v2192_v3 = vadd.f32 -1.0, %v3660_v0 }
 0x24d   :  { %v1287_v60 = vmul.f32 1.442695, %v1226_v15  ;;  %v3707_v53 = vadd.f32 %v2486_v8, %v4013_v21  ;;  %2602 = vpow2.f32 %v1281_v19  ;;  %v1225_v5 = vmin.f32 %v3702_v54, 0.0  ;;  %1557 = vadd.xlane.f32.xlu0 %v1556_v47  ;;  %v1438_v15 = vpop.permute.xlu0 %1437 }
 0x24e   :  { %v1156_v38 = vpop.f32.mrf.mxu1  ;;  %v2591_v20 = vpop.eup %2590  ;;  %v2193_v58 = vadd.f32 -1.0, %v2587_v27  ;;  %vm1185_vm9 = vcmp.gt.f32.partialorder %v3613_v16, 0.0  ;;  %v1341_v36 = vsel %vm1181_vm5, %v3575_v61, %v2191_v17  ;;  %v1342_v7 = vsel %vm1182_vm4, %v3562_v31, %v2192_v3 }
 0x24f   :  { %2604 = vpow2.f32 %v1287_v60  ;;  %v1228_v21 = vmin.f32 %v3707_v53, 0.0  ;;  %1560 = vadd.xlane.f32.xlu1 %v1559_v48  ;;  %v1285_v6 = vmul.f32 1.442695, %v1225_v5  ;;  %v3720_v62 = vadd.f32 %v1156_v38, %v4012_v46  ;;  %v1440_v57 = vpop.permute.xlu1 %1439 }
 0x250   :  { %v2593_v39 = vpop.eup %2592  ;;  %v1562_v46 = vsel %vm115_vm1, %v1500_v40, 0.0  ;;  %v1501_v50 = vmul.f32 %v3629_v10, %v1341_v36  ;;  %v1502_v30 = vmul.f32 %v3651_v24, %v1342_v7  ;;  %v1343_v61 = vsel %vm1183_vm7, %v3595_v34, %v2193_v58 }
 0x251   :  { %v1291_v43 = vmul.f32 1.442695, %v1228_v21  ;;  %2606 = vpow2.f32 %v1285_v6  ;;  %v1227_v42 = vmin.f32 %v3720_v62, 0.0  ;;  %1563 = vadd.xlane.f32.xlu0 %v1562_v46  ;;  %v2194_v29 = vadd.f32 -1.0, %v3675_v9  ;;  %v1442_v38 = vpop.permute.xlu0 %1441 }
 0x252   :  { %v2595_v18 = vpop.eup %2594  ;;  %v1565_v52 = vsel %vm115_vm1, %v1501_v50, 0.0  ;;  %v1503_v49 = vmul.f32 %v3666_v56, %v1343_v61  ;;  %v2195_v10 = vadd.f32 -1.0, %v2591_v20  ;;  %v2196_v63 = vadd.f32 -1.0, %v2589_v33 }
 0x253   :  { %2608 = vpow2.f32 %v1291_v43  ;;  %v1289_v44 = vmul.f32 1.442695, %v1227_v42  ;;  %vm1187_vm10 = vcmp.gt.f32.partialorder %v3632_v32, 0.0  ;;  %1566 = vadd.xlane.f32.xlu1 %v1565_v52  ;;  %v1344_v31 = vsel %vm1184_vm6, %v3585_v11, %v2194_v29  ;;  %v1444_v43 = vpop.permute.xlu1 %1443 }
 0x254   :  { %v2597_v0 = vpop.eup %2596  ;;  %v2197_v24 = vadd.f32 -1.0, %v2595_v18  ;;  %v1568_v34 = vsel %vm115_vm1, %v1502_v30, 0.0  ;;  %v1571_v9 = vsel %vm115_vm1, %v1503_v49, 0.0  ;;  %v1504_v27 = vmul.f32 %v3685_v28, %v1344_v31 }
 0x255   :  { %2610 = vpow2.f32 %v1289_v44  ;;  %v1345_v56 = vsel %vm1185_vm9, %v3613_v16, %v2195_v10  ;;  %1569 = vadd.xlane.f32.xlu0 %v1568_v34  ;;  %v1346_v11 = vsel %vm1186_vm8, %v3599_v12, %v2196_v63  ;;  %v2198_v14 = vadd.f32 -1.0, %v2593_v39  ;;  %v1446_v42 = vpop.permute.xlu0 %1445  ;;  %v2497_v34 = vpop.f32.mrf.mxu1 }
 0x256   :  { %v2599_v45 = vpop.eup %2598  ;;  %v1505_v33 = vmul.f32 %v3695_v41, %v1345_v56  ;;  %v1347_v19 = vsel %vm1187_vm10, %v3632_v32, %v2197_v24  ;;  %vm1188_vm11 = vcmp.gt.f32.partialorder %v3618_v25, 0.0  ;;  %vm1189_vm12 = vcmp.gt.f32.partialorder %v3655_v1, 0.0 }
 0x257   :  { %v2199_v55 = vadd.f32 -1.0, %v2599_v45  ;;  %1572 = vadd.xlane.f32.xlu1 %v1571_v9  ;;  %v1574_v16 = vsel %vm115_vm1, %v1504_v27, 0.0  ;;  %v1506_v60 = vmul.f32 %v1432_v4, %v1346_v11  ;;  %v1507_v41 = vmul.f32 %v1434_v23, %v1347_v19  ;;  %v1448_v30 = vpop.permute.xlu1 %1447  ;;  %v1843_v9 = vpop.f32.mrf.mxu1 }
 0x258   :  { %v2601_v51 = vpop.eup %2600  ;;  %v1577_v8 = vsel %vm115_vm1, %v1505_v33, 0.0  ;;  %v1348_v12 = vsel %vm1188_vm11, %v3618_v25, %v2198_v14  ;;  %v2200_v47 = vadd.f32 -1.0, %v2597_v0  ;;  %vm1190_vm13 = vcmp.gt.f32.partialorder %v3638_v22, 0.0 }
 0x259   :  { %1575 = vadd.xlane.f32.xlu0 %v1574_v16  ;;  %v1349_v32 = vsel %vm1189_vm12, %v3655_v1, %v2199_v55  ;;  %vm1191_vm14 = vcmp.gt.f32.partialorder %v3679_v13, 0.0  ;;  %v1580_v48 = vsel %vm115_vm1, %v1506_v60, 0.0  ;;  %v1583_v21 = vsel %vm115_vm1, %v1507_v41, 0.0  ;;  %v1450_v29 = vpop.permute.xlu0 %1449  ;;  %v2500_v27 = vpop.f32.mrf.mxu1 }
 0x25a   :  { %v2603_v28 = vpop.eup %2602  ;;  %v1508_v39 = vmul.f32 %v1436_v26, %v1348_v12  ;;  %v1509_v4 = vmul.f32 %v1438_v15, %v1349_v32  ;;  %v1350_v25 = vsel %vm1190_vm13, %v3638_v22, %v2200_v47  ;;  %v2202_v37 = vadd.f32 -1.0, %v2601_v51 }
 0x25b   :  { %v2201_v5 = vadd.f32 -1.0, %v2603_v28  ;;  %1578 = vadd.xlane.f32.xlu1 %v1577_v8  ;;  %vm1192_vm15 = vcmp.gt.f32.partialorder %v3663_v35, 0.0  ;;  %vm1193_vm0 = vcmp.gt.f32.partialorder %v3702_v54, 0.0  ;;  %v1510_v23 = vmul.f32 %v1440_v57, %v1350_v25  ;;  %v1452_v31 = vpop.permute.xlu1 %1451  ;;  %v1853_v56 = vpop.f32.mrf.mxu1  ;;  %v3789_v8 = vld [vmem:[#allocation2] ss:$0 sm:$0xff] }
 0x25c   :  { %v2605_v59 = vpop.eup %2604  ;;  %v1586_v3 = vsel %vm115_vm1, %v1508_v39, 0.0  ;;  %v1589_v58 = vsel %vm115_vm1, %v1509_v4, 0.0  ;;  %v1352_v22 = vsel %vm1192_vm15, %v3663_v35, %v2202_v37  ;;  %vm1194_vm2 = vcmp.gt.f32.partialorder %v3683_v2, 0.0 }
 0x25d   :  { %1581 = vadd.xlane.f32.xlu0 %v1580_v48  ;;  %v1351_v1 = vsel %vm1191_vm14, %v3679_v13, %v2201_v5  ;;  %v2204_v18 = vadd.f32 -1.0, %v2605_v59  ;;  %vm1195_vm3 = vcmp.gt.f32.partialorder %v3720_v62, 0.0  ;;  %v1592_v50 = vsel %vm115_vm1, %v1510_v23, 0.0  ;;  %v2503_v51 = vpop.f32.mrf.mxu1 }
 0x25e   :  { %v2607_v20 = vpop.eup %2606  ;;  %v1511_v36 = vmul.f32 %v1442_v38, %v1351_v1  ;;  %v1512_v0 = vmul.f32 %v1444_v43, %v1352_v22  ;;  %vm1196_vm4 = vcmp.gt.f32.partialorder %v3707_v53, 0.0 }
 0x25f   :  { %v2203_v17 = vadd.f32 -1.0, %v2607_v20  ;;  %1584 = vadd.xlane.f32.xlu1 %v1583_v21  ;;  %v1354_v61 = vsel %vm1194_vm2, %v3683_v2, %v2204_v18  ;;  %v1863_v15 = vpop.f32.mrf.mxu1 }
 0x260   :  { %v2609_v6 = vpop.eup %2608  ;;  %v1595_v7 = vsel %vm115_vm1, %v1511_v36, 0.0  ;;  %v1598_v52 = vsel %vm115_vm1, %v1512_v0, 0.0  ;;  %v1514_v10 = vmul.f32 %v1448_v30, %v1354_v61 }
 0x261   :  { %1587 = vadd.xlane.f32.xlu0 %v1586_v3  ;;  %v1353_v13 = vsel %vm1193_vm0, %v3702_v54, %v2203_v17  ;;  %v2206_v54 = vadd.f32 -1.0, %v2609_v6  ;;  %v2506_v33 = vpop.f32.mrf.mxu1 }
 0x262   :  { %v2611_v40 = vpop.eup %2610  ;;  %v1513_v44 = vmul.f32 %v1446_v42, %v1353_v13  ;;  %v1604_v2 = vsel %vm115_vm1, %v1514_v10, 0.0 }
 0x263   :  { %v2205_v46 = vadd.f32 -1.0, %v2611_v40  ;;  %1590 = vadd.xlane.f32.xlu1 %v1589_v58  ;;  %v1356_v26 = vsel %vm1196_vm4, %v3707_v53, %v2206_v54  ;;  %v1873_v53 = vpop.f32.mrf.mxu1 }
 0x264   :  { %v1601_v49 = vsel %vm115_vm1, %v1513_v44, 0.0  ;;  %v1516_v24 = vmul.f32 %v1452_v31, %v1356_v26 }
 0x265   :  { %1593 = vadd.xlane.f32.xlu0 %v1592_v50  ;;  %v1355_v35 = vsel %vm1195_vm3, %v3720_v62, %v2205_v46  ;;  %v2509_v11 = vpop.f32.mrf.mxu1 }
 0x266   :  { %v1515_v63 = vmul.f32 %v1450_v29, %v1355_v35  ;;  %v1610_v45 = vsel %vm115_vm1, %v1516_v24, 0.0 }
 0x267   :  { %1596 = vadd.xlane.f32.xlu1 %v1595_v7  ;;  %v1883_v19 = vpop.f32.mrf.mxu1 }
 0x268   :  { %v1607_v62 = vsel %vm115_vm1, %v1515_v63, 0.0  ;;  %vm2073_vm1 = vcmask 7168  }
 0x269   :  { %1599 = vadd.xlane.f32.xlu0 %v1598_v52  ;;  %v2512_v14 = vpop.f32.mrf.mxu1 }
 0x26b   :  { %1602 = vadd.xlane.f32.xlu1 %v1601_v49  ;;  %v1893_v55 = vpop.f32.mrf.mxu1 }
 0x26d   :  { %1605 = vadd.xlane.f32.xlu0 %v1604_v2  ;;  %v3787_v28 = vpop.f32.mrf.mxu1 }
 0x26f   :  { %1608 = vadd.xlane.f32.xlu1 %v1607_v62  ;;  %v1903_v16 = vpop.f32.mrf.mxu1 }
 0x271   :  { %1611 = vadd.xlane.f32.xlu0 %v1610_v45  ;;  %v3791_v41 = vpop.f32.mrf.mxu1 }
 0x273   :  { %v1913_v47 = vpop.f32.mrf.mxu1 }
 0x275   :  { %v3803_v48 = vpop.f32.mrf.mxu1 }
 0x277   :  { %v1923_v1 = vpop.f32.mrf.mxu1 }
 0x279   :  { %v2524_v23 = vpop.f32.mrf.mxu1 }
 0x27b   :  { %v1933_v50 = vpop.f32.mrf.mxu1 }
 0x27d   :  { %v2527_v61 = vpop.f32.mrf.mxu1 }
 0x27f   :  { %v1943_v10 = vpop.f32.mrf.mxu1 }
 0x281   :  { %v2530_v62 = vpop.f32.mrf.mxu1 }
 0x2b4   :  { %v1522_v60 = vpop.xlane.xlu1 %1521 }
 0x2b5   :  { %v2003_v59 = vadd.f32 %v2497_v34, %v1522_v60 }
 0x2b6   :  { %v1519_v57 = vpop.xlane.xlu0 %1518 }
 0x2b7   :  { %v2042_v12 = vadd.f32 %v3789_v8, %v2003_v59  ;;  %v2002_v32 = vadd.f32 %v1843_v9, %v1519_v57 }
 0x2b9   :  { %2075 = vst.msk [vmem:[%s3966_s8 + $0x8] sm:$0xff] %vm2073_vm1, %v2042_v12  ;;  %v2041_v5 = vadd.f32 %v3789_v8, %v2002_v32 }
 0x2ba   :  { %v1528_v38 = vpop.xlane.xlu0 %1527 }
 0x2bb   :  { %2074 = vst.msk [vmem:[%s3966_s8] sm:$0xff] %vm2073_vm1, %v2041_v5  ;;  %v2005_v20 = vadd.f32 %v2500_v27, %v1528_v38 }
 0x2bd   :  { %v2044_v21 = vadd.f32 %v3789_v8, %v2005_v20 }
 0x2be   :  { %v1525_v39 = vpop.xlane.xlu0 %1524  ;;  %v1531_v4 = vpop.xlane.xlu1 %1530 }
 0x2bf   :  { %2077 = vst.msk [vmem:[%s3966_s8 + $0x18] sm:$0xff] %vm2073_vm1, %v2044_v21  ;;  %v2004_v6 = vadd.f32 %v1853_v56, %v1525_v39  ;;  %v2006_v25 = vadd.f32 %v1863_v15, %v1531_v4  ;;  %v1953_v56 = vpop.f32.mrf.mxu1 }
 0x2c1   :  { %v2043_v37 = vadd.f32 %v3789_v8, %v2004_v6  ;;  %v2045_v17 = vadd.f32 %v3789_v8, %v2006_v25 }
 0x2c2   :  { %v1534_v43 = vpop.xlane.xlu0 %1533 }
 0x2c3   :  { %2076 = vst.msk [vmem:[%s3966_s8 + $0x10] sm:$0xff] %vm2073_vm1, %v2043_v37  ;;  %2078 = vst.msk [vmem:[%s3966_s8 + $0x20] sm:$0xff] %vm2073_vm1, %v2045_v17  ;;  %v2007_v40 = vadd.f32 %v2503_v51, %v1534_v43 }
 0x2c4   :  { %v1537_v3 = vpop.xlane.xlu1 %1536 }
 0x2c5   :  { %v2008_v58 = vadd.f32 %v1873_v53, %v1537_v3  ;;  %v2046_v36 = vadd.f32 %v3789_v8, %v2007_v40 }
 0x2c6   :  { %v1540_v22 = vpop.xlane.xlu0 %1539 }
 0x2c7   :  { %v2047_v42 = vadd.f32 %v3789_v8, %v2008_v58  ;;  %2079 = vst.msk [vmem:[%s3966_s8 + $0x28] sm:$0xff] %vm2073_vm1, %v2046_v36  ;;  %v2009_v13 = vadd.f32 %v2506_v33, %v1540_v22 }
 0x2c8   :  { %v1543_v18 = vpop.xlane.xlu1 %1542 }
 0x2c9   :  { %2080 = vst.msk [vmem:[%s3966_s8 + $0x30] sm:$0xff] %vm2073_vm1, %v2047_v42  ;;  %v2010_v46 = vadd.f32 %v1883_v19, %v1543_v18  ;;  %v2048_v7 = vadd.f32 %v3789_v8, %v2009_v13 }
 0x2ca   :  { %v1546_v44 = vpop.xlane.xlu0 %1545 }
 0x2cb   :  { %v2049_v0 = vadd.f32 %v3789_v8, %v2010_v46  ;;  %2081 = vst.msk [vmem:[%s3966_s8 + $0x38] sm:$0xff] %vm2073_vm1, %v2048_v7  ;;  %v2011_v30 = vadd.f32 %v2509_v11, %v1546_v44  ;;  %v2533_v11 = vpop.f32.mrf.mxu1 }
 0x2cd   :  { %2082 = vst.msk [vmem:[%s3966_s8 + $0x40] sm:$0xff] %vm2073_vm1, %v2049_v0  ;;  %v2050_v35 = vadd.f32 %v3789_v8, %v2011_v30  ;;  %v1963_v59 = vpop.f32.mrf.mxu1 }
 0x2ce   :  { %v1549_v54 = vpop.xlane.xlu1 %1548  ;;  %v1552_v52 = vpop.xlane.xlu0 %1551 }
 0x2cf   :  { %v2012_v29 = vadd.f32 %v1893_v55, %v1549_v54  ;;  %2083 = vst.msk [vmem:[%s3966_s8 + $0x48] sm:$0xff] %vm2073_vm1, %v2050_v35  ;;  %v2013_v49 = vadd.f32 %v2512_v14, %v1552_v52  ;;  %v2536_v38 = vpop.f32.mrf.mxu1 }
 0x2d1   :  { %v2051_v63 = vadd.f32 %v3789_v8, %v2012_v29  ;;  %v2052_v26 = vadd.f32 %v3789_v8, %v2013_v49  ;;  %v1973_v25 = vpop.f32.mrf.mxu1 }
 0x2d3   :  { %2084 = vst.msk [vmem:[%s3966_s8 + $0x50] sm:$0xff] %vm2073_vm1, %v2051_v63  ;;  %2085 = vst.msk [vmem:[%s3966_s8 + $0x58] sm:$0xff] %vm2073_vm1, %v2052_v26  ;;  %v2539_v58 = vpop.f32.mrf.mxu1 }
 0x2d4   :  { %v1555_v31 = vpop.xlane.xlu1 %1554 }
 0x2d5   :  { %v2014_v2 = vadd.f32 %v1903_v16, %v1555_v31  ;;  %v1983_v46 = vpop.f32.mrf.mxu1 }
 0x2d6   :  { %v1558_v45 = vpop.xlane.xlu0 %1557 }
 0x2d7   :  { %v2053_v24 = vadd.f32 %v3789_v8, %v2014_v2  ;;  %v2015_v34 = vadd.f32 %v3787_v28, %v1558_v45  ;;  %v2542_v35 = vpop.f32.mrf.mxu1 }
 0x2d8   :  { %v1561_v9 = vpop.xlane.xlu1 %1560 }
 0x2d9   :  { %2086 = vst.msk [vmem:[%s3966_s8 + $0x60] sm:$0xff] %vm2073_vm1, %v2053_v24  ;;  %v2016_v27 = vadd.f32 %v1913_v47, %v1561_v9  ;;  %v2054_v51 = vadd.f32 %v3789_v8, %v2015_v34  ;;  %v1993_v26 = vpop.f32.mrf.mxu1 }
 0x2da   :  { %v1564_v33 = vpop.xlane.xlu0 %1563 }
 0x2db   :  { %v2055_v15 = vadd.f32 %v3789_v8, %v2016_v27  ;;  %2087 = vst.msk [vmem:[%s3966_s8 + $0x68] sm:$0xff] %vm2073_vm1, %v2054_v51  ;;  %v2017_v53 = vadd.f32 %v3791_v41, %v1564_v33 }
 0x2dc   :  { %v1567_v19 = vpop.xlane.xlu1 %1566 }
 0x2dd   :  { %2088 = vst.msk [vmem:[%s3966_s8 + $0x70] sm:$0xff] %vm2073_vm1, %v2055_v15  ;;  %v2056_v14 = vadd.f32 %v3789_v8, %v2017_v53  ;;  %v2018_v55 = vadd.f32 %v1923_v1, %v1567_v19 }
 0x2de   :  { %v1570_v28 = vpop.xlane.xlu0 %1569 }
 0x2df   :  { %2089 = vst.msk [vmem:[%s3966_s8 + $0x78] sm:$0xff] %vm2073_vm1, %v2056_v14  ;;  %v2057_v16 = vadd.f32 %v3789_v8, %v2018_v55  ;;  %v2019_v60 = vadd.f32 %v3803_v48, %v1570_v28 }
 0x2e0   :  { %v1573_v57 = vpop.xlane.xlu1 %1572 }
 0x2e1   :  { %2090 = vst.msk [vmem:[%s3966_s8 + $0x80] sm:$0xff] %vm2073_vm1, %v2057_v16  ;;  %v2058_v41 = vadd.f32 %v3789_v8, %v2019_v60  ;;  %v2020_v12 = vadd.f32 %v1933_v50, %v1573_v57 }
 0x2e2   :  { %v1576_v32 = vpop.xlane.xlu0 %1575 }
 0x2e3   :  { %2091 = vst.msk [vmem:[%s3966_s8 + $0x88] sm:$0xff] %vm2073_vm1, %v2058_v41  ;;  %v2059_v47 = vadd.f32 %v3789_v8, %v2020_v12  ;;  %v2021_v5 = vadd.f32 %v2524_v23, %v1576_v32 }
 0x2e4   :  { %v1579_v20 = vpop.xlane.xlu1 %1578 }
 0x2e5   :  { %2092 = vst.msk [vmem:[%s3966_s8 + $0x90] sm:$0xff] %vm2073_vm1, %v2059_v47  ;;  %v2060_v48 = vadd.f32 %v3789_v8, %v2021_v5  ;;  %v2022_v21 = vadd.f32 %v1943_v10, %v1579_v20 }
 0x2e6   :  { %v1582_v39 = vpop.xlane.xlu0 %1581 }
 0x2e7   :  { %2093 = vst.msk [vmem:[%s3966_s8 + $0x98] sm:$0xff] %vm2073_vm1, %v2060_v48  ;;  %v2061_v4 = vadd.f32 %v3789_v8, %v2022_v21  ;;  %v2023_v6 = vadd.f32 %v2527_v61, %v1582_v39 }
 0x2e8   :  { %v1585_v1 = vpop.xlane.xlu1 %1584 }
 0x2e9   :  { %2094 = vst.msk [vmem:[%s3966_s8 + $0xa0] sm:$0xff] %vm2073_vm1, %v2061_v4  ;;  %v2062_v37 = vadd.f32 %v3789_v8, %v2023_v6  ;;  %v2024_v17 = vadd.f32 %v1953_v56, %v1585_v1 }
 0x2ea   :  { %v1588_v43 = vpop.xlane.xlu0 %1587 }
 0x2eb   :  { %2095 = vst.msk [vmem:[%s3966_s8 + $0xa8] sm:$0xff] %vm2073_vm1, %v2062_v37  ;;  %v2063_v40 = vadd.f32 %v3789_v8, %v2024_v17  ;;  %v2025_v3 = vadd.f32 %v2530_v62, %v1588_v43 }
 0x2ec   :  { %v1591_v23 = vpop.xlane.xlu1 %1590 }
 0x2ed   :  { %2096 = vst.msk [vmem:[%s3966_s8 + $0xb0] sm:$0xff] %vm2073_vm1, %v2063_v40  ;;  %v2064_v36 = vadd.f32 %v3789_v8, %v2025_v3  ;;  %v2026_v42 = vadd.f32 %v1963_v59, %v1591_v23 }
 0x2ee   :  { %v1594_v22 = vpop.xlane.xlu0 %1593 }
 0x2ef   :  { %2097 = vst.msk [vmem:[%s3966_s8 + $0xb8] sm:$0xff] %vm2073_vm1, %v2064_v36  ;;  %v2065_v13 = vadd.f32 %v3789_v8, %v2026_v42  ;;  %v2027_v18 = vadd.f32 %v2533_v11, %v1594_v22 }
 0x2f0   :  { %v1597_v50 = vpop.xlane.xlu1 %1596 }
 0x2f1   :  { %2098 = vst.msk [vmem:[%s3966_s8 + $0xc0] sm:$0xff] %vm2073_vm1, %v2065_v13  ;;  %v2066_v7 = vadd.f32 %v3789_v8, %v2027_v18  ;;  %v2028_v0 = vadd.f32 %v1973_v25, %v1597_v50 }
 0x2f2   :  { %v1600_v44 = vpop.xlane.xlu0 %1599 }
 0x2f3   :  { %2099 = vst.msk [vmem:[%s3966_s8 + $0xc8] sm:$0xff] %vm2073_vm1, %v2066_v7  ;;  %v2067_v30 = vadd.f32 %v3789_v8, %v2028_v0  ;;  %v2029_v61 = vadd.f32 %v2536_v38, %v1600_v44 }
 0x2f4   :  { %v1603_v54 = vpop.xlane.xlu1 %1602 }
 0x2f5   :  { %2100 = vst.msk [vmem:[%s3966_s8 + $0xd0] sm:$0xff] %vm2073_vm1, %v2067_v30  ;;  %v2068_v29 = vadd.f32 %v3789_v8, %v2029_v61  ;;  %v2030_v52 = vadd.f32 %v1983_v46, %v1603_v54 }
 0x2f6   :  { %v1606_v49 = vpop.xlane.xlu0 %1605 }
 0x2f7   :  { %2101 = vst.msk [vmem:[%s3966_s8 + $0xd8] sm:$0xff] %vm2073_vm1, %v2068_v29  ;;  %v2069_v10 = vadd.f32 %v3789_v8, %v2030_v52  ;;  %v2031_v63 = vadd.f32 %v2539_v58, %v1606_v49 }
 0x2f8   :  { %v1609_v31 = vpop.xlane.xlu1 %1608 }
 0x2f9   :  { %2102 = vst.msk [vmem:[%s3966_s8 + $0xe0] sm:$0xff] %vm2073_vm1, %v2069_v10  ;;  %v2070_v2 = vadd.f32 %v3789_v8, %v2031_v63  ;;  %v2032_v62 = vadd.f32 %v1993_v26, %v1609_v31 }
 0x2fa   :  { %v1612_v24 = vpop.xlane.xlu0 %1611 }
 0x2fb   :  { %2103 = vst.msk [vmem:[%s3966_s8 + $0xe8] sm:$0xff] %vm2073_vm1, %v2070_v2  ;;  %v2071_v45 = vadd.f32 %v3789_v8, %v2032_v62  ;;  %v2033_v34 = vadd.f32 %v2542_v35, %v1612_v24 }
 0x2fd   :  { %2104 = vst.msk [vmem:[%s3966_s8 + $0xf0] sm:$0xff] %vm2073_vm1, %v2071_v45  ;;  %v2072_v9 = vadd.f32 %v3789_v8, %v2033_v34 }
 0x2ff   :  { %2105 = vst.msk [vmem:[%s3966_s8 + $0xf8] sm:$0xff] %vm2073_vm1, %v2072_v9 }

</bundles_post_ra>
